<compile_context>
chip_gen: v7x
topology: tpu7x:2x2x1
jax: 0.10.0
libtpu: 0.0.40
codegen_flags: <defaults>
</compile_context>

<pallas_src>
import functools

import jax
import jax.numpy as jnp
from jax.experimental import pallas as pl
from jax.experimental.pallas import tpu as pltpu


def _conv2d_vpu_kernel(x_ref, w_ref, b_ref, o_ref, *,
                       c_in, c_out, kh_size, kw_size, h_size, w_size):
    """Valid conv2d over a block of TN set-elements, pure-VPU formulation.

    x_ref : (TN, C_in, H*W)          VMEM, lane axis = flattened spatial (lane-dense)
    w_ref : (C_in*KH*KW, C_out, 1)   VMEM, C_out on the sublane axis
    b_ref : (C_out, 1)               VMEM
    o_ref : (TN, C_out, H*W)         VMEM; lane p = h*W + w valid for h<H_out, w<W_out
    """
    hw = h_size * w_size
    tn = x_ref.shape[0]
    taps = kh_size * kw_size

    x = x_ref[...].astype(jnp.float32)                       # (tn, c_in, hw)

    # Single accumulator with C_out on the sublane axis (all 8 sublanes used);
    # bias folded into the init via one lane-broadcast.
    acc = jnp.broadcast_to(b_ref[...].astype(jnp.float32), (tn, c_out, hw))

    # (tn, c_out, hw) <-> (tn*c_out, hw) is a free retiling only when c_out fills
    # whole sublane tiles; use it so the tap shift is a plain rank-2 lane rotation.
    lanes_ok = (c_out % 8 == 0)

    for ci in range(c_in):
        # One sublane slice + sublane broadcast per input channel, hoisted out of the
        # tap loop: channel plane replicated across the C_out sublanes.
        plane = jnp.broadcast_to(x[:, ci:ci + 1, :], (tn, c_out, hw))
        plane2d = plane.reshape(tn * c_out, hw) if lanes_ok else None

        for kh in range(kh_size):                             # static unrolled tap loop
            for kw in range(kw_size):
                d = kh * w_size + kw
                if d == 0:
                    xs = plane
                elif lanes_ok:
                    # xs[..., p] = plane[..., (p + d) % hw] (jnp.roll semantics with
                    # shift = hw - d).  Wrapped lanes only land in output positions
                    # outside the valid (H_out, W_out) window (sliced off by wrapper).
                    xs = pltpu.roll(plane2d, hw - d, axis=1).reshape(tn, c_out, hw)
                else:
                    # TODO(synk): c_out not a multiple of 8 -> keep the (slower but
                    # known-good) concatenate shift instead of an odd-shaped retiling.
                    xs = jnp.concatenate([plane[:, :, d:], plane[:, :, :d]], axis=-1)

                wv = w_ref[ci * taps + kh * kw_size + kw]     # (c_out, 1) weight column
                acc = acc + wv * xs                           # VPU FMA over all sublanes

    # One unmasked, lane-dense full-block store (no per-channel masked stores).
    o_ref[...] = acc.astype(o_ref.dtype)


def context_free_encoder_conv2d(x, weight, bias):
    """ContextFreeEncoder forward with a Conv2d element encoder.

    x      : (B, S, C_in, H, W)    float32 (PyTorch NCHW per element)
    weight : (C_out, C_in, KH, KW) float32 (PyTorch OIHW)
    bias   : (C_out,)              float32
    returns: (B, S, C_out, H_out, W_out)
    """
    B, S, C_in, H, W = x.shape
    C_out, _, KH, KW = weight.shape
    H_out = H - KH + 1
    W_out = W - KW + 1
    N = B * S
    HW = H * W

    # reshape_input: (B, S, C_in, H, W) -> (N, C_in, H*W). Pure view, no transpose.
    x_flat = x.reshape(N, C_in, HW)
    # Weights laid out (C_in*KH*KW, C_out, 1): C_out on the sublane axis so one vector
    # FMA covers all output channels (no per-FMA SMEM scalar loads in the kernel).
    w_cols = jnp.transpose(weight.astype(jnp.float32), (1, 2, 3, 0)) \
        .reshape(C_in * KH * KW, C_out)[:, :, None]
    b_col = bias.astype(jnp.float32).reshape(C_out, 1)

    # Single grid step: on 1-TC chips (v5e/v6e) any split is a strictly sequential
    # loop that only adds per-step overhead at this problem size.
    # TODO(synk): for large N, tile tn to a multiple of 8 (<= ~32 rows to stay in the
    # vreg file), grow the grid instead of the block, and consider CORE_PARALLEL on
    # v7x (2 TensorCores, 64 MiB VMEM per core).
    tn = N
    num_blocks = 1

    kernel = functools.partial(
        _conv2d_vpu_kernel,
        c_in=C_in, c_out=C_out, kh_size=KH, kw_size=KW, h_size=H, w_size=W)

    flops = 2 * N * C_out * HW * C_in * KH * KW
    bytes_accessed = int((x_flat.size + N * C_out * HW) * x.dtype.itemsize
                         + w_cols.size * 4 + b_col.size * 4)

    out_full = pl.pallas_call(
        kernel,
        out_shape=jax.ShapeDtypeStruct((N, C_out, HW), x.dtype),
        grid=(num_blocks,),
        in_specs=[
            pl.BlockSpec((tn, C_in, HW), lambda i: (i, 0, 0)),
            pl.BlockSpec((C_in * KH * KW, C_out, 1), lambda i: (0, 0, 0)),
            pl.BlockSpec((C_out, 1), lambda i: (0, 0)),
        ],
        out_specs=pl.BlockSpec((tn, C_out, HW), lambda i: (i, 0, 0)),
        compiler_params=pltpu.CompilerParams(
            dimension_semantics=("arbitrary",)),
        cost_estimate=pl.CostEstimate(
            flops=flops, transcendentals=0, bytes_accessed=bytes_accessed),
    )(x_flat, w_cols, b_col)

    # reshape_output: keep only the valid conv window, then split batch/set.
    # TODO(synk): this slice should fuse into whatever consumes the encoder output;
    # if it shows up as a separate HBM round trip, emit only h < H_out rows from the
    # kernel instead (at the cost of masked stores on a 240-lane output).
    out = out_full.reshape(N, C_out, H, W)[:, :, :H_out, :W_out]
    return out.reshape(B, S, C_out, H_out, W_out)


def _reference(x, weight, bias):
    B, S, C_in, H, W = x.shape
    x_flat = x.reshape(B * S, C_in, H, W)
    out = jax.lax.conv_general_dilated(
        x_flat, weight, window_strides=(1, 1), padding="VALID",
        dimension_numbers=("NCHW", "OIHW", "NCHW"))
    out = out + bias.reshape(1, -1, 1, 1)
    return out.reshape(B, S, *out.shape[1:])


if __name__ == "__main__":
    key = jax.random.PRNGKey(0)
    kx, kwt, kb = jax.random.split(key, 3)

    B, S = 2, 3           # batch size, set size
    C_in, H, W = 4, 16, 16
    C_out, KH, KW = 8, 2, 2

    x = jax.random.normal(kx, (B, S, C_in, H, W), dtype=jnp.float32)
    weight = jax.random.normal(kwt, (C_out, C_in, KH, KW), dtype=jnp.float32) * 0.1
    bias = jax.random.normal(kb, (C_out,), dtype=jnp.float32) * 0.1

    out = jax.block_until_ready(context_free_encoder_conv2d(x, weight, bias))
    ref = jax.block_until_ready(_reference(x, weight, bias))

    assert out.shape == (B, S, C_out, H - KH + 1, W - KW + 1), out.shape
    max_err = float(jnp.max(jnp.abs(out - ref)))
    assert jnp.allclose(out, ref, atol=1e-4, rtol=1e-4), max_err

    print("KERNEL_OK")
</pallas_src>

<mosaic_0001>
module attributes {stable_mosaic.version = 11 : i64} {
  func.func @_conv2d_vpu_kernel(%arg0: i32, %arg1: memref<6x4x256xf32, #tpu.memory_space<vmem>>, %arg2: memref<16x8x1xf32, #tpu.memory_space<vmem>>, %arg3: memref<8x1xf32, #tpu.memory_space<vmem>>, %arg4: memref<6x8x256xf32, #tpu.memory_space<vmem>>) attributes {dimension_semantics = [#tpu.dimension_semantics<arbitrary>], iteration_bounds = array<i64: 1>, scalar_prefetch = 0 : i64, scratch_operands = 0 : i64, tpu.core_type = #tpu.core_type<tc>, window_params = [{transform_indices = @transform_0, window_bounds = array<i64: 6, 4, 256>}, {pipeline_mode = #tpu.pipeline_mode<synchronous>, transform_indices = @transform_1, window_bounds = array<i64: 16, 8, 1>}, {pipeline_mode = #tpu.pipeline_mode<synchronous>, transform_indices = @transform_2, window_bounds = array<i64: 8, 1>}, {transform_indices = @transform_3, window_bounds = array<i64: 6, 8, 256>}]} {
    %c0 = arith.constant 0 : index
    %c0_0 = arith.constant 0 : index
    %c0_1 = arith.constant 0 : index
    %0 = vector.load %arg1[%c0, %c0_0, %c0_1] : memref<6x4x256xf32, #tpu.memory_space<vmem>>, vector<6x4x256xf32>
    %c0_2 = arith.constant 0 : index
    %c0_3 = arith.constant 0 : index
    %1 = vector.load %arg3[%c0_2, %c0_3] : memref<8x1xf32, #tpu.memory_space<vmem>>, vector<8x1xf32>
    %2 = vector.shape_cast %1 : vector<8x1xf32> to vector<1x8x1xf32>
    %3 = vector.broadcast %2 : vector<1x8x1xf32> to vector<6x8x256xf32>
    %4 = vector.extract_strided_slice %0 {offsets = [0, 0, 0], sizes = [6, 1, 256], strides = [1, 1, 1]} : vector<6x4x256xf32> to vector<6x1x256xf32>
    %5 = vector.shape_cast %4 : vector<6x1x256xf32> to vector<6x1x256xf32>
    %6 = vector.broadcast %5 : vector<6x1x256xf32> to vector<6x8x256xf32>
    %7 = vector.shape_cast %6 : vector<6x8x256xf32> to vector<48x256xf32>
    %c0_4 = arith.constant 0 : index
    %c0_5 = arith.constant 0 : index
    %c0_6 = arith.constant 0 : index
    %8 = vector.load %arg2[%c0_4, %c0_5, %c0_6] : memref<16x8x1xf32, #tpu.memory_space<vmem>>, vector<1x8x1xf32>
    %9 = vector.shape_cast %8 : vector<1x8x1xf32> to vector<8x1xf32>
    %10 = vector.shape_cast %9 : vector<8x1xf32> to vector<1x8x1xf32>
    %11 = vector.broadcast %10 : vector<1x8x1xf32> to vector<6x8x256xf32>
    %12 = arith.mulf %11, %6 : vector<6x8x256xf32>
    %13 = arith.addf %3, %12 : vector<6x8x256xf32>
    %c255_i32 = arith.constant 255 : i32
    %14 = tpu.dynamic_rotate %7 by %c255_i32 dim 1 : vector<48x256xf32>, i32 -> vector<48x256xf32>
    %15 = vector.shape_cast %14 : vector<48x256xf32> to vector<6x8x256xf32>
    %c1 = arith.constant 1 : index
    %c0_7 = arith.constant 0 : index
    %c0_8 = arith.constant 0 : index
    %16 = vector.load %arg2[%c1, %c0_7, %c0_8] : memref<16x8x1xf32, #tpu.memory_space<vmem>>, vector<1x8x1xf32>
    %17 = vector.shape_cast %16 : vector<1x8x1xf32> to vector<8x1xf32>
    %18 = vector.shape_cast %17 : vector<8x1xf32> to vector<1x8x1xf32>
    %19 = vector.broadcast %18 : vector<1x8x1xf32> to vector<6x8x256xf32>
    %20 = arith.mulf %19, %15 : vector<6x8x256xf32>
    %21 = arith.addf %13, %20 : vector<6x8x256xf32>
    %c240_i32 = arith.constant 240 : i32
    %22 = tpu.dynamic_rotate %7 by %c240_i32 dim 1 : vector<48x256xf32>, i32 -> vector<48x256xf32>
    %23 = vector.shape_cast %22 : vector<48x256xf32> to vector<6x8x256xf32>
    %c2 = arith.constant 2 : index
    %c0_9 = arith.constant 0 : index
    %c0_10 = arith.constant 0 : index
    %24 = vector.load %arg2[%c2, %c0_9, %c0_10] : memref<16x8x1xf32, #tpu.memory_space<vmem>>, vector<1x8x1xf32>
    %25 = vector.shape_cast %24 : vector<1x8x1xf32> to vector<8x1xf32>
    %26 = vector.shape_cast %25 : vector<8x1xf32> to vector<1x8x1xf32>
    %27 = vector.broadcast %26 : vector<1x8x1xf32> to vector<6x8x256xf32>
    %28 = arith.mulf %27, %23 : vector<6x8x256xf32>
    %29 = arith.addf %21, %28 : vector<6x8x256xf32>
    %c239_i32 = arith.constant 239 : i32
    %30 = tpu.dynamic_rotate %7 by %c239_i32 dim 1 : vector<48x256xf32>, i32 -> vector<48x256xf32>
    %31 = vector.shape_cast %30 : vector<48x256xf32> to vector<6x8x256xf32>
    %c3 = arith.constant 3 : index
    %c0_11 = arith.constant 0 : index
    %c0_12 = arith.constant 0 : index
    %32 = vector.load %arg2[%c3, %c0_11, %c0_12] : memref<16x8x1xf32, #tpu.memory_space<vmem>>, vector<1x8x1xf32>
    %33 = vector.shape_cast %32 : vector<1x8x1xf32> to vector<8x1xf32>
    %34 = vector.shape_cast %33 : vector<8x1xf32> to vector<1x8x1xf32>
    %35 = vector.broadcast %34 : vector<1x8x1xf32> to vector<6x8x256xf32>
    %36 = arith.mulf %35, %31 : vector<6x8x256xf32>
    %37 = arith.addf %29, %36 : vector<6x8x256xf32>
    %38 = vector.extract_strided_slice %0 {offsets = [0, 1, 0], sizes = [6, 1, 256], strides = [1, 1, 1]} : vector<6x4x256xf32> to vector<6x1x256xf32>
    %39 = vector.shape_cast %38 : vector<6x1x256xf32> to vector<6x1x256xf32>
    %40 = vector.broadcast %39 : vector<6x1x256xf32> to vector<6x8x256xf32>
    %41 = vector.shape_cast %40 : vector<6x8x256xf32> to vector<48x256xf32>
    %c4 = arith.constant 4 : index
    %c0_13 = arith.constant 0 : index
    %c0_14 = arith.constant 0 : index
    %42 = vector.load %arg2[%c4, %c0_13, %c0_14] : memref<16x8x1xf32, #tpu.memory_space<vmem>>, vector<1x8x1xf32>
    %43 = vector.shape_cast %42 : vector<1x8x1xf32> to vector<8x1xf32>
    %44 = vector.shape_cast %43 : vector<8x1xf32> to vector<1x8x1xf32>
    %45 = vector.broadcast %44 : vector<1x8x1xf32> to vector<6x8x256xf32>
    %46 = arith.mulf %45, %40 : vector<6x8x256xf32>
    %47 = arith.addf %37, %46 : vector<6x8x256xf32>
    %c255_i32_15 = arith.constant 255 : i32
    %48 = tpu.dynamic_rotate %41 by %c255_i32_15 dim 1 : vector<48x256xf32>, i32 -> vector<48x256xf32>
    %49 = vector.shape_cast %48 : vector<48x256xf32> to vector<6x8x256xf32>
    %c5 = arith.constant 5 : index
    %c0_16 = arith.constant 0 : index
    %c0_17 = arith.constant 0 : index
    %50 = vector.load %arg2[%c5, %c0_16, %c0_17] : memref<16x8x1xf32, #tpu.memory_space<vmem>>, vector<1x8x1xf32>
    %51 = vector.shape_cast %50 : vector<1x8x1xf32> to vector<8x1xf32>
    %52 = vector.shape_cast %51 : vector<8x1xf32> to vector<1x8x1xf32>
    %53 = vector.broadcast %52 : vector<1x8x1xf32> to vector<6x8x256xf32>
    %54 = arith.mulf %53, %49 : vector<6x8x256xf32>
    %55 = arith.addf %47, %54 : vector<6x8x256xf32>
    %c240_i32_18 = arith.constant 240 : i32
    %56 = tpu.dynamic_rotate %41 by %c240_i32_18 dim 1 : vector<48x256xf32>, i32 -> vector<48x256xf32>
    %57 = vector.shape_cast %56 : vector<48x256xf32> to vector<6x8x256xf32>
    %c6 = arith.constant 6 : index
    %c0_19 = arith.constant 0 : index
    %c0_20 = arith.constant 0 : index
    %58 = vector.load %arg2[%c6, %c0_19, %c0_20] : memref<16x8x1xf32, #tpu.memory_space<vmem>>, vector<1x8x1xf32>
    %59 = vector.shape_cast %58 : vector<1x8x1xf32> to vector<8x1xf32>
    %60 = vector.shape_cast %59 : vector<8x1xf32> to vector<1x8x1xf32>
    %61 = vector.broadcast %60 : vector<1x8x1xf32> to vector<6x8x256xf32>
    %62 = arith.mulf %61, %57 : vector<6x8x256xf32>
    %63 = arith.addf %55, %62 : vector<6x8x256xf32>
    %c239_i32_21 = arith.constant 239 : i32
    %64 = tpu.dynamic_rotate %41 by %c239_i32_21 dim 1 : vector<48x256xf32>, i32 -> vector<48x256xf32>
    %65 = vector.shape_cast %64 : vector<48x256xf32> to vector<6x8x256xf32>
    %c7 = arith.constant 7 : index
    %c0_22 = arith.constant 0 : index
    %c0_23 = arith.constant 0 : index
    %66 = vector.load %arg2[%c7, %c0_22, %c0_23] : memref<16x8x1xf32, #tpu.memory_space<vmem>>, vector<1x8x1xf32>
    %67 = vector.shape_cast %66 : vector<1x8x1xf32> to vector<8x1xf32>
    %68 = vector.shape_cast %67 : vector<8x1xf32> to vector<1x8x1xf32>
    %69 = vector.broadcast %68 : vector<1x8x1xf32> to vector<6x8x256xf32>
    %70 = arith.mulf %69, %65 : vector<6x8x256xf32>
    %71 = arith.addf %63, %70 : vector<6x8x256xf32>
    %72 = vector.extract_strided_slice %0 {offsets = [0, 2, 0], sizes = [6, 1, 256], strides = [1, 1, 1]} : vector<6x4x256xf32> to vector<6x1x256xf32>
    %73 = vector.shape_cast %72 : vector<6x1x256xf32> to vector<6x1x256xf32>
    %74 = vector.broadcast %73 : vector<6x1x256xf32> to vector<6x8x256xf32>
    %75 = vector.shape_cast %74 : vector<6x8x256xf32> to vector<48x256xf32>
    %c8 = arith.constant 8 : index
    %c0_24 = arith.constant 0 : index
    %c0_25 = arith.constant 0 : index
    %76 = vector.load %arg2[%c8, %c0_24, %c0_25] : memref<16x8x1xf32, #tpu.memory_space<vmem>>, vector<1x8x1xf32>
    %77 = vector.shape_cast %76 : vector<1x8x1xf32> to vector<8x1xf32>
    %78 = vector.shape_cast %77 : vector<8x1xf32> to vector<1x8x1xf32>
    %79 = vector.broadcast %78 : vector<1x8x1xf32> to vector<6x8x256xf32>
    %80 = arith.mulf %79, %74 : vector<6x8x256xf32>
    %81 = arith.addf %71, %80 : vector<6x8x256xf32>
    %c255_i32_26 = arith.constant 255 : i32
    %82 = tpu.dynamic_rotate %75 by %c255_i32_26 dim 1 : vector<48x256xf32>, i32 -> vector<48x256xf32>
    %83 = vector.shape_cast %82 : vector<48x256xf32> to vector<6x8x256xf32>
    %c9 = arith.constant 9 : index
    %c0_27 = arith.constant 0 : index
    %c0_28 = arith.constant 0 : index
    %84 = vector.load %arg2[%c9, %c0_27, %c0_28] : memref<16x8x1xf32, #tpu.memory_space<vmem>>, vector<1x8x1xf32>
    %85 = vector.shape_cast %84 : vector<1x8x1xf32> to vector<8x1xf32>
    %86 = vector.shape_cast %85 : vector<8x1xf32> to vector<1x8x1xf32>
    %87 = vector.broadcast %86 : vector<1x8x1xf32> to vector<6x8x256xf32>
    %88 = arith.mulf %87, %83 : vector<6x8x256xf32>
    %89 = arith.addf %81, %88 : vector<6x8x256xf32>
    %c240_i32_29 = arith.constant 240 : i32
    %90 = tpu.dynamic_rotate %75 by %c240_i32_29 dim 1 : vector<48x256xf32>, i32 -> vector<48x256xf32>
    %91 = vector.shape_cast %90 : vector<48x256xf32> to vector<6x8x256xf32>
    %c10 = arith.constant 10 : index
    %c0_30 = arith.constant 0 : index
    %c0_31 = arith.constant 0 : index
    %92 = vector.load %arg2[%c10, %c0_30, %c0_31] : memref<16x8x1xf32, #tpu.memory_space<vmem>>, vector<1x8x1xf32>
    %93 = vector.shape_cast %92 : vector<1x8x1xf32> to vector<8x1xf32>
    %94 = vector.shape_cast %93 : vector<8x1xf32> to vector<1x8x1xf32>
    %95 = vector.broadcast %94 : vector<1x8x1xf32> to vector<6x8x256xf32>
    %96 = arith.mulf %95, %91 : vector<6x8x256xf32>
    %97 = arith.addf %89, %96 : vector<6x8x256xf32>
    %c239_i32_32 = arith.constant 239 : i32
    %98 = tpu.dynamic_rotate %75 by %c239_i32_32 dim 1 : vector<48x256xf32>, i32 -> vector<48x256xf32>
    %99 = vector.shape_cast %98 : vector<48x256xf32> to vector<6x8x256xf32>
    %c11 = arith.constant 11 : index
    %c0_33 = arith.constant 0 : index
    %c0_34 = arith.constant 0 : index
    %100 = vector.load %arg2[%c11, %c0_33, %c0_34] : memref<16x8x1xf32, #tpu.memory_space<vmem>>, vector<1x8x1xf32>
    %101 = vector.shape_cast %100 : vector<1x8x1xf32> to vector<8x1xf32>
    %102 = vector.shape_cast %101 : vector<8x1xf32> to vector<1x8x1xf32>
    %103 = vector.broadcast %102 : vector<1x8x1xf32> to vector<6x8x256xf32>
    %104 = arith.mulf %103, %99 : vector<6x8x256xf32>
    %105 = arith.addf %97, %104 : vector<6x8x256xf32>
    %106 = vector.extract_strided_slice %0 {offsets = [0, 3, 0], sizes = [6, 1, 256], strides = [1, 1, 1]} : vector<6x4x256xf32> to vector<6x1x256xf32>
    %107 = vector.shape_cast %106 : vector<6x1x256xf32> to vector<6x1x256xf32>
    %108 = vector.broadcast %107 : vector<6x1x256xf32> to vector<6x8x256xf32>
    %109 = vector.shape_cast %108 : vector<6x8x256xf32> to vector<48x256xf32>
    %c12 = arith.constant 12 : index
    %c0_35 = arith.constant 0 : index
    %c0_36 = arith.constant 0 : index
    %110 = vector.load %arg2[%c12, %c0_35, %c0_36] : memref<16x8x1xf32, #tpu.memory_space<vmem>>, vector<1x8x1xf32>
    %111 = vector.shape_cast %110 : vector<1x8x1xf32> to vector<8x1xf32>
    %112 = vector.shape_cast %111 : vector<8x1xf32> to vector<1x8x1xf32>
    %113 = vector.broadcast %112 : vector<1x8x1xf32> to vector<6x8x256xf32>
    %114 = arith.mulf %113, %108 : vector<6x8x256xf32>
    %115 = arith.addf %105, %114 : vector<6x8x256xf32>
    %c255_i32_37 = arith.constant 255 : i32
    %116 = tpu.dynamic_rotate %109 by %c255_i32_37 dim 1 : vector<48x256xf32>, i32 -> vector<48x256xf32>
    %117 = vector.shape_cast %116 : vector<48x256xf32> to vector<6x8x256xf32>
    %c13 = arith.constant 13 : index
    %c0_38 = arith.constant 0 : index
    %c0_39 = arith.constant 0 : index
    %118 = vector.load %arg2[%c13, %c0_38, %c0_39] : memref<16x8x1xf32, #tpu.memory_space<vmem>>, vector<1x8x1xf32>
    %119 = vector.shape_cast %118 : vector<1x8x1xf32> to vector<8x1xf32>
    %120 = vector.shape_cast %119 : vector<8x1xf32> to vector<1x8x1xf32>
    %121 = vector.broadcast %120 : vector<1x8x1xf32> to vector<6x8x256xf32>
    %122 = arith.mulf %121, %117 : vector<6x8x256xf32>
    %123 = arith.addf %115, %122 : vector<6x8x256xf32>
    %c240_i32_40 = arith.constant 240 : i32
    %124 = tpu.dynamic_rotate %109 by %c240_i32_40 dim 1 : vector<48x256xf32>, i32 -> vector<48x256xf32>
    %125 = vector.shape_cast %124 : vector<48x256xf32> to vector<6x8x256xf32>
    %c14 = arith.constant 14 : index
    %c0_41 = arith.constant 0 : index
    %c0_42 = arith.constant 0 : index
    %126 = vector.load %arg2[%c14, %c0_41, %c0_42] : memref<16x8x1xf32, #tpu.memory_space<vmem>>, vector<1x8x1xf32>
    %127 = vector.shape_cast %126 : vector<1x8x1xf32> to vector<8x1xf32>
    %128 = vector.shape_cast %127 : vector<8x1xf32> to vector<1x8x1xf32>
    %129 = vector.broadcast %128 : vector<1x8x1xf32> to vector<6x8x256xf32>
    %130 = arith.mulf %129, %125 : vector<6x8x256xf32>
    %131 = arith.addf %123, %130 : vector<6x8x256xf32>
    %c239_i32_43 = arith.constant 239 : i32
    %132 = tpu.dynamic_rotate %109 by %c239_i32_43 dim 1 : vector<48x256xf32>, i32 -> vector<48x256xf32>
    %133 = vector.shape_cast %132 : vector<48x256xf32> to vector<6x8x256xf32>
    %c15 = arith.constant 15 : index
    %c0_44 = arith.constant 0 : index
    %c0_45 = arith.constant 0 : index
    %134 = vector.load %arg2[%c15, %c0_44, %c0_45] : memref<16x8x1xf32, #tpu.memory_space<vmem>>, vector<1x8x1xf32>
    %135 = vector.shape_cast %134 : vector<1x8x1xf32> to vector<8x1xf32>
    %136 = vector.shape_cast %135 : vector<8x1xf32> to vector<1x8x1xf32>
    %137 = vector.broadcast %136 : vector<1x8x1xf32> to vector<6x8x256xf32>
    %138 = arith.mulf %137, %133 : vector<6x8x256xf32>
    %139 = arith.addf %131, %138 : vector<6x8x256xf32>
    %c0_46 = arith.constant 0 : index
    %c0_47 = arith.constant 0 : index
    %c0_48 = arith.constant 0 : index
    %140 = vector.load %arg4[%c0_46, %c0_47, %c0_48] : memref<6x8x256xf32, #tpu.memory_space<vmem>>, vector<6x8x256xf32>
    tpu.vector_store %arg4[%c0_46, %c0_47, %c0_48], %139 {strides = array<i32>} : memref<6x8x256xf32, #tpu.memory_space<vmem>>, vector<6x8x256xf32>,
    return
  }
  func.func @transform_0(%arg0: i32) -> (i32, i32, i32) {
    %c0_i32 = arith.constant 0 : i32
    %c0_i32_0 = arith.constant 0 : i32
    %c0_i32_1 = arith.constant 0 : i32
    return %arg0, %c0_i32, %c0_i32_0 : i32, i32, i32
  }
  func.func @transform_1(%arg0: i32) -> (i32, i32, i32) {
    %c0_i32 = arith.constant 0 : i32
    %c0_i32_0 = arith.constant 0 : i32
    %c0_i32_1 = arith.constant 0 : i32
    %c0_i32_2 = arith.constant 0 : i32
    return %c0_i32, %c0_i32_0, %c0_i32_1 : i32, i32, i32
  }
  func.func @transform_2(%arg0: i32) -> (i32, i32) {
    %c0_i32 = arith.constant 0 : i32
    %c0_i32_0 = arith.constant 0 : i32
    %c0_i32_1 = arith.constant 0 : i32
    return %c0_i32, %c0_i32_0 : i32, i32
  }
  func.func @transform_3(%arg0: i32) -> (i32, i32, i32) {
    %c0_i32 = arith.constant 0 : i32
    %c0_i32_0 = arith.constant 0 : i32
    %c0_i32_1 = arith.constant 0 : i32
    return %arg0, %c0_i32, %c0_i32_0 : i32, i32, i32
  }
}

</mosaic_0001>

<bundles_post_ra>
// kernel: tpu_custom_call.1
= control target key start
LH: loop header
LB: loop body
LE: loop exit
PB: predicated region body
PF: predicated region fallthrough
CT: control target
= control target key end

     0   :  { %v2817_v1 = vlaneseq  ;;  %v1473_v2 = vmov 0   ;;  %s2813_s0 = inlined_call_operand.vmem [shape: f32[6,4,256], index: 0, kind: input, shape index: {}]   ;;  %s2814_s1 = inlined_call_operand.vmem [shape: f32[16,8,1], index: 1, kind: input, shape index: {}]   ;;  %s2815_s2 = inlined_call_operand.vmem [shape: f32[8,1], index: 2, kind: input, shape index: {}]   ;;  %s2816_s3 = inlined_call_operand.hbm [shape: f32[6,8,256], index: 3, kind: output, shape index: {}]  }
   0x1   :  { %v21_v0 = vld [vmem:[%s2815_s2] sm:$0xff]  ;;  %1447 = vset.pattern.permute.xlu0 %v1473_v2  ;;  %1448 = vset.pattern.permute.xlu1 %v1473_v2  ;;  %v1509_v4 = vld [vmem:[%s2813_s0 + $0x10] sm:$0xff]  ;;  %v1527_v8 = vld [vmem:[%s2813_s0 + $0x8] sm:$0xff] }
   0x2   :  { %24 = vperm.xlu0 %1447, %v21_v0   ;;  %v141_v3 = vld [vmem:[%s2814_s1] sm:$0xff]  ;;  %v1512_v5 = vshrl.u32 %v2817_v1, 7 }
   0x3   :  { %v1517_v6 = vld [vmem:[%s2813_s0] sm:$0xff] }
   0x4   :  { %v1522_v7 = vld [vmem:[%s2813_s0 + $0x20] sm:$0xff]  ;;  %v35_v9 = vsub.s32 0, %v1512_v5  ;;  %v39_v10 = vsub.s32 4, %v1512_v5 }
   0x5   :  { %8 = vsyncpa [#allocation3], 0  ;;  %v1538_v15 = vld [vmem:[%s2813_s0 + $0x18] sm:$0xff]  ;;  %s1474_s25 = smov 127   ;;  %v1557_v22 = vld [vmem:[%s2813_s0 + $0x28] sm:$0xff]  ;;  %s1475_s29 = smov 112  }
   0x6   :  { %144 = vperm.xlu0 %1447, %v141_v3   ;;  %v52_v11 = vrot.slane %v1509_v4, %v35_v9  ;;  %v36_v12 = vrot.slane %v1517_v6, %v35_v9  ;;  %v68_v13 = vrot.slane %v1522_v7, %v35_v9  ;;  %v44_v14 = vrot.slane %v1527_v8, %v35_v9  ;;  %v1425_v36 = vld [vmem:[%s2814_s1 + $0x8] sm:$0xff]  ;;  %s1476_s30 = smov 111   ;;  %v1426_v38 = vld [vmem:[%s2814_s1 + $0x10] sm:$0xff]  ;;  %v1427_v41 = vld [vmem:[%s2814_s1 + $0x18] sm:$0xff] }
   0x7   :  { %v40_v18 = vrot.slane %v1517_v6, %v39_v10  ;;  %v60_v21 = vrot.slane %v1538_v15, %v35_v9  ;;  %v56_v23 = vrot.slane %v1509_v4, %v39_v10  ;;  %v76_v26 = vrot.slane %v1557_v22, %v35_v9  ;;  %v1428_v48 = vld [vmem:[%s2814_s1 + $0x20] sm:$0xff]  ;;  %v1429_v3 = vld [vmem:[%s2814_s1 + $0x28] sm:$0xff] }
   0x8   :  { %v1540_v16 = vrot.slane %v52_v11, %v35_v9  ;;  %v1542_v17 = vrot.slane %v36_v12, %v35_v9  ;;  %v1549_v19 = vrot.slane %v68_v13, %v35_v9  ;;  %v1551_v20 = vrot.slane %v44_v14, %v35_v9 }
   0x9   :  { %v1564_v24 = vrot.slane %v40_v18, %v35_v9  ;;  %v1566_v25 = vrot.slane %v60_v21, %v35_v9  ;;  %v1569_v27 = vrot.slane %v56_v23, %v35_v9  ;;  %v1575_v28 = vrot.slane %v76_v26, %v35_v9  ;;  %v1430_v23 = vld [vmem:[%s2814_s1 + $0x30] sm:$0xff] }
   0xa   :  { %175 = vrot.lane.b32.xlu0 %v1540_v16, %s1474_s25  ;;  %171 = vrot.lane.b32.xlu1 %v1542_v17, %s1474_s25  ;;  %v72_v29 = vrot.slane %v1522_v7, %v39_v10  ;;  %v48_v30 = vrot.slane %v1527_v8, %v39_v10  ;;  %v64_v33 = vrot.slane %v1538_v15, %v39_v10  ;;  %v379_v39 = vsub.s32 1, %v1512_v5 }
   0xb   :  { %v80_v35 = vrot.slane %v1557_v22, %v39_v10  ;;  %v383_v47 = vsub.s32 5, %v1512_v5 }
   0xc   :  { %v1583_v31 = vrot.slane %v72_v29, %v35_v9  ;;  %v1585_v32 = vrot.slane %v48_v30, %v35_v9  ;;  %v1592_v34 = vrot.slane %v64_v33, %v35_v9  ;;  %v380_v40 = vrot.slane %v1517_v6, %v379_v39 }
   0xd   :  { %v1600_v37 = vrot.slane %v80_v35, %v35_v9  ;;  %v396_v43 = vrot.slane %v1509_v4, %v379_v39  ;;  %v412_v44 = vrot.slane %v1522_v7, %v379_v39  ;;  %v388_v46 = vrot.slane %v1527_v8, %v379_v39 }
   0xe   :  { %179 = vrot.lane.b32.xlu0 %v1549_v19, %s1474_s25  ;;  %173 = vrot.lane.b32.xlu1 %v1551_v20, %s1474_s25  ;;  %v1658_v42 = vrot.slane %v380_v40, %v379_v39  ;;  %v384_v51 = vrot.slane %v1517_v6, %v383_v47  ;;  %v404_v52 = vrot.slane %v1538_v15, %v379_v39 }
   0xf   :  { %v1666_v45 = vrot.slane %v396_v43, %v379_v39  ;;  %v1673_v49 = vrot.slane %v412_v44, %v379_v39  ;;  %v1677_v50 = vrot.slane %v388_v46, %v379_v39  ;;  %v400_v53 = vrot.slane %v1509_v4, %v383_v47  ;;  %v1431_v44 = vld [vmem:[%s2814_s1 + $0x38] sm:$0xff] }
  0x10   :  { %2871 = vst [vmem:[#allocation5_spill] sm:$0xff] %v1658_v42  ;;  %v1686_v54 = vrot.slane %v384_v51, %v379_v39  ;;  %v1688_v55 = vrot.slane %v404_v52, %v379_v39  ;;  %v420_v56 = vrot.slane %v1557_v22, %v379_v39  ;;  %v416_v57 = vrot.slane %v1522_v7, %v383_v47 }
  0x11   :  { %2872 = vst [vmem:[#allocation6_spill] sm:$0xff] %v1666_v45  ;;  %2873 = vst [vmem:[#allocation7_spill] sm:$0xff] %v1673_v49  ;;  %v1696_v58 = vrot.slane %v400_v53, %v379_v39  ;;  %v392_v60 = vrot.slane %v1527_v8, %v383_v47  ;;  %v408_v63 = vrot.slane %v1538_v15, %v383_v47 }
  0x12   :  { %183 = vrot.lane.b32.xlu0 %v1564_v24, %s1474_s25  ;;  %177 = vrot.lane.b32.xlu1 %v1566_v25, %s1474_s25  ;;  %2874 = vst [vmem:[#allocation8_spill] sm:$0xff] %v1677_v50  ;;  %2875 = vst [vmem:[#allocation9_spill] sm:$0xff] %v1686_v54  ;;  %v1698_v59 = vrot.slane %v420_v56, %v379_v39  ;;  %v1705_v61 = vrot.slane %v416_v57, %v379_v39 }
  0x13   :  { %2876 = vst [vmem:[#allocation10_spill] sm:$0xff] %v1688_v55  ;;  %2877 = vst [vmem:[#allocation11_spill] sm:$0xff] %v1696_v58  ;;  %v1707_v62 = vrot.slane %v392_v60, %v379_v39  ;;  %v1714_v0 = vrot.slane %v408_v63, %v379_v39  ;;  %v424_v2 = vrot.slane %v1557_v22, %v383_v47  ;;  %v723_v60 = vsub.s32 6, %v1512_v5 }
  0x14   :  { %2878 = vst [vmem:[#allocation12_spill] sm:$0xff] %v1698_v59  ;;  %2879 = vst [vmem:[#allocation13_spill] sm:$0xff] %v1705_v61 }
  0x15   :  { %2880 = vst [vmem:[#allocation14_spill] sm:$0xff] %v1707_v62  ;;  %2881 = vst [vmem:[#allocation15_spill] sm:$0xff] %v1714_v0  ;;  %v1722_v9 = vrot.slane %v424_v2, %v379_v39  ;;  %v719_v39 = vsub.s32 2, %v1512_v5  ;;  %v1432_v2 = vld [vmem:[%s2814_s1 + $0x40] sm:$0xff] }
  0x16   :  { %187 = vrot.lane.b32.xlu0 %v1569_v27, %s1474_s25  ;;  %181 = vrot.lane.b32.xlu1 %v1575_v28, %s1474_s25 }
  0x17   :  { %2882 = vst [vmem:[#allocation16_spill] sm:$0xff] %v1722_v9  ;;  %v720_v43 = vrot.slane %v1517_v6, %v719_v39  ;;  %v736_v51 = vrot.slane %v1509_v4, %v719_v39  ;;  %v752_v53 = vrot.slane %v1522_v7, %v719_v39  ;;  %v728_v57 = vrot.slane %v1527_v8, %v719_v39 }
  0x19   :  { %v1826_v56 = vrot.slane %v736_v51, %v719_v39  ;;  %v744_v51 = vrot.slane %v1538_v15, %v719_v39 }
  0x1a   :  { %191 = vrot.lane.b32.xlu0 %v1583_v31, %s1474_s25  ;;  %185 = vrot.lane.b32.xlu1 %v1585_v32, %s1474_s25 }
  0x1b   :  { %2885 = vst [vmem:[#allocation19_spill] sm:$0xff] %v1826_v56 }
  0x1e   :  { %214 = vperm.xlu0 %1447, %v1425_v36   ;;  %189 = vrot.lane.b32.xlu1 %v1592_v34, %s1474_s25 }
  0x22   :  { %243 = vrot.lane.b32.xlu0 %v1551_v20, %s1475_s29  ;;  %193 = vrot.lane.b32.xlu1 %v1600_v37, %s1474_s25 }
  0x26   :  { %247 = vrot.lane.b32.xlu0 %v1566_v25, %s1475_s29  ;;  %241 = vrot.lane.b32.xlu1 %v1542_v17, %s1475_s29 }
  0x2a   :  { %251 = vrot.lane.b32.xlu0 %v1575_v28, %s1475_s29  ;;  %245 = vrot.lane.b32.xlu1 %v1540_v16, %s1475_s29 }
  0x2e   :  { %255 = vrot.lane.b32.xlu0 %v1585_v32, %s1475_s29  ;;  %249 = vrot.lane.b32.xlu1 %v1549_v19, %s1475_s29 }
  0x32   :  { %259 = vrot.lane.b32.xlu0 %v1592_v34, %s1475_s29  ;;  %253 = vrot.lane.b32.xlu1 %v1564_v24, %s1475_s29 }
  0x36   :  { %263 = vrot.lane.b32.xlu0 %v1600_v37, %s1475_s29  ;;  %257 = vrot.lane.b32.xlu1 %v1569_v27, %s1475_s29 }
  0x3a   :  { %309 = vrot.lane.b32.xlu0 %v1542_v17, %s1476_s30  ;;  %261 = vrot.lane.b32.xlu1 %v1583_v31, %s1475_s29 }
  0x3e   :  { %313 = vrot.lane.b32.xlu0 %v1540_v16, %s1476_s30  ;;  %282 = vperm.xlu1 %1448, %v1426_v38  }
  0x42   :  { %317 = vrot.lane.b32.xlu0 %v1549_v19, %s1476_s30  ;;  %311 = vrot.lane.b32.xlu1 %v1551_v20, %s1476_s30 }
  0x46   :  { %321 = vrot.lane.b32.xlu0 %v1564_v24, %s1476_s30  ;;  %315 = vrot.lane.b32.xlu1 %v1566_v25, %s1476_s30 }
  0x4a   :  { %325 = vrot.lane.b32.xlu0 %v1569_v27, %s1476_s30  ;;  %319 = vrot.lane.b32.xlu1 %v1575_v28, %s1476_s30 }
  0x4e   :  { %329 = vrot.lane.b32.xlu0 %v1583_v31, %s1476_s30  ;;  %323 = vrot.lane.b32.xlu1 %v1585_v32, %s1476_s30 }
  0x52   :  { %350 = vperm.xlu0 %1447, %v1427_v41   ;;  %327 = vrot.lane.b32.xlu1 %v1592_v34, %s1476_s30 }
  0x56   :  { %516 = vrot.lane.b32.xlu0 %v1658_v42, %s1474_s25  ;;  %331 = vrot.lane.b32.xlu1 %v1600_v37, %s1476_s30 }
  0x5a   :  { %520 = vrot.lane.b32.xlu0 %v1666_v45, %s1474_s25  ;;  %489 = vperm.xlu1 %1448, %v1428_v48   ;;  %v1816_v48 = vrot.slane %v720_v43, %v719_v39  ;;  %v1841_v43 = vrot.slane %v728_v57, %v719_v39  ;;  %v1856_v57 = vrot.slane %v744_v51, %v719_v39 }
  0x5c   :  { %2884 = vst [vmem:[#allocation18_spill] sm:$0xff] %v1816_v48  ;;  %2888 = vst [vmem:[#allocation22_spill] sm:$0xff] %v1841_v43 }
  0x5d   :  { %2891 = vst [vmem:[#allocation25_spill] sm:$0xff] %v1856_v57 }
  0x5e   :  { %524 = vrot.lane.b32.xlu0 %v1673_v49, %s1474_s25  ;;  %518 = vrot.lane.b32.xlu1 %v1677_v50, %s1474_s25 }
  0x62   :  { %528 = vrot.lane.b32.xlu0 %v1686_v54, %s1474_s25  ;;  %522 = vrot.lane.b32.xlu1 %v1688_v55, %s1474_s25 }
  0x66   :  { %532 = vrot.lane.b32.xlu0 %v1696_v58, %s1474_s25  ;;  %526 = vrot.lane.b32.xlu1 %v1698_v59, %s1474_s25 }
  0x6a   :  { %536 = vrot.lane.b32.xlu0 %v1705_v61, %s1474_s25  ;;  %530 = vrot.lane.b32.xlu1 %v1707_v62, %s1474_s25 }
  0x6e   :  { %556 = vperm.xlu0 %1447, %v1429_v3   ;;  %534 = vrot.lane.b32.xlu1 %v1714_v0, %s1474_s25 }
  0x72   :  { %585 = vrot.lane.b32.xlu0 %v1677_v50, %s1475_s29  ;;  %538 = vrot.lane.b32.xlu1 %v1722_v9, %s1474_s25 }
  0x76   :  { %589 = vrot.lane.b32.xlu0 %v1688_v55, %s1475_s29  ;;  %583 = vrot.lane.b32.xlu1 %v1658_v42, %s1475_s29 }
  0x7a   :  { %593 = vrot.lane.b32.xlu0 %v1698_v59, %s1475_s29  ;;  %587 = vrot.lane.b32.xlu1 %v1666_v45, %s1475_s29 }
  0x7c   :  { %v1736_v10 = vpop.permute.xlu1 %171 }
  0x7e   :  { %597 = vrot.lane.b32.xlu0 %v1707_v62, %s1475_s29  ;;  %591 = vrot.lane.b32.xlu1 %v1673_v49, %s1475_s29 }
  0x80   :  { %v1742_v11 = vpop.permute.xlu1 %173 }
  0x81   :  { %v1744_v12 = vpop.permute.xlu0 %24 }
  0x82   :  { %601 = vrot.lane.b32.xlu0 %v1714_v0, %s1475_s29  ;;  %595 = vrot.lane.b32.xlu1 %v1686_v54, %s1475_s29 }
  0x84   :  { %v1750_v13 = vpop.permute.xlu1 %177 }
  0x85   :  { %v1752_v14 = vpop.permute.xlu0 %144 }
  0x86   :  { %605 = vrot.lane.b32.xlu0 %v1722_v9, %s1475_s29  ;;  %599 = vrot.lane.b32.xlu1 %v1696_v58, %s1475_s29 }
  0x88   :  { %v1758_v18 = vpop.permute.xlu1 %181 }
  0x89   :  { %v1760_v21 = vpop.permute.xlu0 %175 }
  0x8a   :  { %650 = vrot.lane.b32.xlu0 %v1658_v42, %s1476_s30  ;;  %603 = vrot.lane.b32.xlu1 %v1705_v61, %s1475_s29  ;;  %v756_v42 = vrot.slane %v1522_v7, %v723_v60 }
  0x8c   :  { %v1769_v26 = vpop.permute.xlu1 %185 }
  0x8d   :  { %v1771_v29 = vpop.permute.xlu0 %179 }
  0x8e   :  { %654 = vrot.lane.b32.xlu0 %v1666_v45, %s1476_s30  ;;  %623 = vperm.xlu1 %1448, %v1430_v23   ;;  %v1837_v23 = vrot.slane %v752_v53, %v719_v39 }
  0x90   :  { %v1775_v30 = vpop.permute.xlu1 %189  ;;  %2887 = vst [vmem:[#allocation21_spill] sm:$0xff] %v1837_v23 }
  0x91   :  { %v1777_v33 = vpop.permute.xlu0 %183 }
  0x92   :  { %658 = vrot.lane.b32.xlu0 %v1673_v49, %s1476_s30  ;;  %652 = vrot.lane.b32.xlu1 %v1677_v50, %s1476_s30  ;;  %v740_v49 = vrot.slane %v1509_v4, %v723_v60 }
  0x94   :  { %v1783_v35 = vpop.permute.xlu1 %193  ;;  %v1861_v45 = vrot.slane %v740_v49, %v719_v39  ;;  %v1879_v49 = vrot.slane %v756_v42, %v719_v39  ;;  %v1433_v42 = vld [vmem:[%s2814_s1 + $0x48] sm:$0xff] }
  0x95   :  { %v1785_v36 = vpop.permute.xlu0 %187 }
  0x96   :  { %662 = vrot.lane.b32.xlu0 %v1686_v54, %s1476_s30  ;;  %656 = vrot.lane.b32.xlu1 %v1688_v55, %s1476_s30  ;;  %2892 = vst [vmem:[#allocation26_spill] sm:$0xff] %v1861_v45  ;;  %2894 = vst [vmem:[#allocation28_spill] sm:$0xff] %v1879_v49  ;;  %v764_v55 = vrot.slane %v1557_v22, %v723_v60 }
  0x98   :  { %v1798_v40 = vpop.permute.xlu1 %241 }
  0x99   :  { %v1791_v38 = vpop.permute.xlu0 %191 }
  0x9a   :  { %666 = vrot.lane.b32.xlu0 %v1696_v58, %s1476_s30  ;;  %660 = vrot.lane.b32.xlu1 %v1698_v59, %s1476_s30 }
  0x9c   :  { %v1810_v46 = vpop.permute.xlu1 %245 }
  0x9d   :  { %v1800_v41 = vpop.permute.xlu0 %214 }
  0x9e   :  { %670 = vrot.lane.b32.xlu0 %v1705_v61, %s1476_s30  ;;  %664 = vrot.lane.b32.xlu1 %v1707_v62, %s1476_s30 }
  0xa0   :  { %v1830_v63 = vpop.permute.xlu1 %249 }
  0xa1   :  { %v1812_v47 = vpop.permute.xlu0 %243  ;;  %2886 = vst [vmem:[#allocation20_spill] sm:$0xff] %v1830_v63 }
  0xa2   :  { %2883 = vst [vmem:[#allocation17_spill] sm:$0xff] %v1812_v47  ;;  %690 = vperm.xlu0 %1447, %v1431_v44   ;;  %668 = vrot.lane.b32.xlu1 %v1714_v0, %s1476_s30  ;;  %v724_v44 = vrot.slane %v1517_v6, %v723_v60 }
  0xa4   :  { %v1845_v1 = vpop.permute.xlu1 %253  ;;  %v1854_v53 = vrot.slane %v724_v44, %v719_v39  ;;  %v732_v44 = vrot.slane %v1527_v8, %v723_v60 }
  0xa5   :  { %v1819_v52 = vpop.permute.xlu0 %247 }
  0xa6   :  { %856 = vrot.lane.b32.xlu0 %v1816_v48, %s1474_s25  ;;  %672 = vrot.lane.b32.xlu1 %v1722_v9, %s1476_s30  ;;  %2890 = vst [vmem:[#allocation24_spill] sm:$0xff] %v1854_v53  ;;  %v1881_v50 = vrot.slane %v732_v44, %v719_v39 }
  0xa8   :  { %v1871_v51 = vpop.permute.xlu1 %257  ;;  %2895 = vst [vmem:[#allocation29_spill] sm:$0xff] %v1881_v50 }
  0xa9   :  { %v1835_v3 = vpop.permute.xlu0 %251 }
  0xaa   :  { %860 = vrot.lane.b32.xlu0 %v1826_v56, %s1474_s25  ;;  %829 = vperm.xlu1 %1448, %v1432_v2   ;;  %v760_v2 = vrot.slane %v1557_v22, %v719_v39 }
  0xac   :  { %v1867_v54 = vrot.slane %v760_v2, %v719_v39  ;;  %v748_v2 = vrot.slane %v1538_v15, %v723_v60  ;;  %v1884_v9 = vpop.permute.xlu1 %261 }
  0xad   :  { %v1847_v61 = vpop.permute.xlu0 %255  ;;  %2896 = vst [vmem:[#allocation30_spill] sm:$0xff] %v1884_v9 }
  0xae   :  { %2889 = vst [vmem:[#allocation23_spill] sm:$0xff] %v1847_v61  ;;  %864 = vrot.lane.b32.xlu0 %v1837_v23, %s1474_s25  ;;  %858 = vrot.lane.b32.xlu1 %v1841_v43, %s1474_s25  ;;  %2893 = vst [vmem:[#allocation27_spill] sm:$0xff] %v1867_v54  ;;  %v1892_v0 = vrot.slane %v748_v2, %v719_v39 }
  0xb0   :  { %2898 = vst [vmem:[#allocation32_spill] sm:$0xff] %v1892_v0 }
  0xb1   :  { %v1859_v58 = vpop.permute.xlu0 %259 }
  0xb2   :  { %868 = vrot.lane.b32.xlu0 %v1854_v53, %s1474_s25  ;;  %862 = vrot.lane.b32.xlu1 %v1856_v57, %s1474_s25 }
  0xb5   :  { %v1873_v62 = vpop.permute.xlu0 %263 }
  0xb6   :  { %872 = vrot.lane.b32.xlu0 %v1861_v45, %s1474_s25  ;;  %866 = vrot.lane.b32.xlu1 %v1867_v54, %s1474_s25 }
  0xb9   :  { %v1886_v59 = vpop.permute.xlu0 %309 }
  0xba   :  { %2897 = vst [vmem:[#allocation31_spill] sm:$0xff] %v1886_v59  ;;  %876 = vrot.lane.b32.xlu0 %v1879_v49, %s1474_s25  ;;  %870 = vrot.lane.b32.xlu1 %v1881_v50, %s1474_s25  ;;  %v1904_v59 = vrot.slane %v764_v55, %v719_v39 }
  0xbc   :  { %2900 = vst [vmem:[#allocation34_spill] sm:$0xff] %v1904_v59 }
  0xbd   :  { %v1898_v44 = vpop.permute.xlu0 %313  ;;  %v1900_v63 = vpop.permute.xlu1 %282 }
  0xbe   :  { %2899 = vst [vmem:[#allocation33_spill] sm:$0xff] %v1898_v44  ;;  %896 = vperm.xlu0 %1447, %v1433_v42   ;;  %874 = vrot.lane.b32.xlu1 %v1892_v0, %s1474_s25 }
  0xc1   :  { %v1906_v9 = vpop.permute.xlu0 %317  ;;  %v1908_v2 = vpop.permute.xlu1 %311 }
  0xc2   :  { %2901 = vst [vmem:[#allocation35_spill] sm:$0xff] %v1906_v9  ;;  %2902 = vst [vmem:[#allocation36_spill] sm:$0xff] %v1908_v2  ;;  %925 = vrot.lane.b32.xlu0 %v1841_v43, %s1475_s29  ;;  %878 = vrot.lane.b32.xlu1 %v1904_v59, %s1474_s25 }
  0xc5   :  { %v1914_v60 = vpop.permute.xlu0 %321  ;;  %v1916_v44 = vpop.permute.xlu1 %315 }
  0xc6   :  { %2903 = vst [vmem:[#allocation37_spill] sm:$0xff] %v1914_v60  ;;  %2904 = vst [vmem:[#allocation38_spill] sm:$0xff] %v1916_v44  ;;  %929 = vrot.lane.b32.xlu0 %v1856_v57, %s1475_s29  ;;  %923 = vrot.lane.b32.xlu1 %v1816_v48, %s1475_s29  ;;  %v1937_v60 = vsub.s32 3, %v1512_v5 }
  0xc9   :  { %v1922_v55 = vpop.permute.xlu0 %325  ;;  %v1924_v39 = vpop.permute.xlu1 %319 }
  0xca   :  { %2905 = vst [vmem:[#allocation39_spill] sm:$0xff] %v1922_v55  ;;  %2906 = vst [vmem:[#allocation40_spill] sm:$0xff] %v1924_v39  ;;  %933 = vrot.lane.b32.xlu0 %v1867_v54, %s1475_s29  ;;  %927 = vrot.lane.b32.xlu1 %v1826_v56, %s1475_s29  ;;  %v2909_v55 = vlaneseq  ;;  %v157_v54 = vmul.f32 %v1752_v14, %v1575_v28  ;;  %v147_v28 = vmul.f32 %v1752_v14, %v1542_v17 }
  0xcc   :  { %v1942_v39 = vand.u32 127, %v2909_v55  ;;  %v1092_v55 = vrot.slane %v1522_v7, %v1937_v60 }
  0xcd   :  { %v1930_v42 = vpop.permute.xlu0 %329  ;;  %v1932_v9 = vpop.permute.xlu1 %323 }
  0xce   :  { %2907 = vst [vmem:[#allocation41_spill] sm:$0xff] %v1930_v42  ;;  %2908 = vst [vmem:[#allocation42_spill] sm:$0xff] %v1932_v9  ;;  %937 = vrot.lane.b32.xlu0 %v1881_v50, %s1475_s29  ;;  %931 = vrot.lane.b32.xlu1 %v1837_v23, %s1475_s29  ;;  %v1060_v42 = vrot.slane %v1517_v6, %v1937_v60  ;;  %v1076_v9 = vrot.slane %v1509_v4, %v1937_v60  ;;  %vm197_vm0 = vcmp.lt.s32.totalorder %v1942_v39, 127 }
  0xcf   :  { %v153_v50 = vmul.f32 %v1752_v14, %v1566_v25  ;;  %v158_v25 = vmul.f32 %v1752_v14, %v1600_v37  ;;  %vm265_vm1 = vcmp.lt.s32.totalorder %v1942_v39, 112  ;;  %vm333_vm2 = vcmp.lt.s32.totalorder %v1942_v39, 111 }
  0xd0   :  { %v1970_v47 = vrot.slane %v1060_v42, %v1937_v60  ;;  %v1973_v61 = vrot.slane %v1076_v9, %v1937_v60  ;;  %v1986_v42 = vrot.slane %v1092_v55, %v1937_v60  ;;  %v149_v9 = vmul.f32 %v1752_v14, %v1551_v20 }
  0xd1   :  { %v1944_v2 = vpop.permute.xlu0 %350  ;;  %v1946_v44 = vpop.permute.xlu1 %327  ;;  %v2004_v55 = vsub.s32 7, %v1512_v5  ;;  %v151_v20 = vmul.f32 %v1752_v14, %v1540_v16  ;;  %v156_v5 = vmul.f32 %v1752_v14, %v1583_v31  ;;  %v169_v16 = vadd.f32 %v157_v54, %v1744_v12 }
  0xd2   :  { %2910 = vst [vmem:[#allocation43_spill] sm:$0xff] %v1944_v2  ;;  %2911 = vst [vmem:[#allocation44_spill] sm:$0xff] %v1946_v44  ;;  %941 = vrot.lane.b32.xlu0 %v1892_v0, %s1475_s29  ;;  %935 = vrot.lane.b32.xlu1 %v1854_v53, %s1475_s29  ;;  %v1068_v0 = vrot.slane %v1527_v8, %v1937_v60  ;;  %v159_v54 = vadd.f32 %v147_v28, %v1744_v12 }
  0xd3   :  { %2914 = vst [vmem:[#allocation47_spill] sm:$0xff] %v1970_v47  ;;  %2915 = vst [vmem:[#allocation48_spill] sm:$0xff] %v1973_v61  ;;  %v150_v61 = vmul.f32 %v1752_v14, %v1585_v32  ;;  %v152_v32 = vmul.f32 %v1752_v14, %v1569_v27  ;;  %v170_v27 = vadd.f32 %v158_v25, %v1744_v12 }
  0xd4   :  { %v2001_v47 = vrot.slane %v1068_v0, %v1937_v60  ;;  %v155_v0 = vmul.f32 %v1752_v14, %v1549_v19  ;;  %v161_v19 = vadd.f32 %v149_v9, %v1744_v12  ;;  %v163_v9 = vadd.f32 %v151_v20, %v1744_v12 }
  0xd5   :  { %v1959_v2 = vpop.permute.xlu0 %516  ;;  %v1961_v44 = vpop.permute.xlu1 %331  ;;  %v162_v31 = vadd.f32 %v150_v61, %v1744_v12  ;;  %v164_v61 = vadd.f32 %v152_v32, %v1744_v12  ;;  %v201_v28 = vsel %vm197_vm0, %v1750_v13, %v1775_v30  ;;  %v2061_v20 = vadd.f32 %v156_v5, %v1744_v12 }
  0xd6   :  { %2912 = vst [vmem:[#allocation45_spill] sm:$0xff] %v1959_v2  ;;  %2913 = vst [vmem:[#allocation46_spill] sm:$0xff] %v1961_v44  ;;  %945 = vrot.lane.b32.xlu0 %v1904_v59, %s1475_s29  ;;  %v1084_v2 = vrot.slane %v1538_v15, %v1937_v60  ;;  %v154_v44 = vmul.f32 %v1752_v14, %v1592_v34  ;;  %939 = vrot.lane.b32.xlu1 %v1861_v45, %s1475_s29 }
  0xd7   :  { %v148_v34 = vmul.f32 %v1752_v14, %v1564_v24  ;;  %v165_v24 = vadd.f32 %v153_v50, %v1744_v12  ;;  %v1100_v50 = vrot.slane %v1557_v22, %v1937_v60  ;;  %v207_v32 = vsel %vm197_vm0, %v1775_v30, %v1750_v13 }
  0xd8   :  { %v2014_v17 = vrot.slane %v1084_v2, %v1937_v60  ;;  %v1434_v2 = vld [vmem:[%s2814_s1 + $0x50] sm:$0xff]  ;;  %v209_v13 = vsel %vm197_vm0, %v1783_v35, %v1758_v18  ;;  %v200_v30 = vsel %vm197_vm0, %v1760_v21, %v1785_v36 }
  0xd9   :  { %v1996_v59 = vpop.permute.xlu0 %520  ;;  %v1998_v37 = vpop.permute.xlu1 %489  ;;  %v160_v14 = vadd.f32 %v148_v34, %v1744_v12  ;;  %v205_v34 = vsel %vm197_vm0, %v1769_v26, %v1742_v11 }
  0xda   :  { %2916 = vst [vmem:[#allocation49_spill] sm:$0xff] %v1996_v59  ;;  %990 = vrot.lane.b32.xlu0 %v1816_v48, %s1476_s30  ;;  %2917 = vst [vmem:[#allocation50_spill] sm:$0xff] %v2014_v17  ;;  %v166_v59 = vadd.f32 %v154_v44, %v1744_v12  ;;  %943 = vrot.lane.b32.xlu1 %v1879_v49, %s1475_s29  ;;  %v199_v44 = vsel %vm197_vm0, %v1742_v11, %v1769_v26 }
  0xdb   :  { %v1072_v17 = vrot.slane %v1527_v8, %v2004_v55  ;;  %v2058_v8 = vadd.f32 %v155_v0, %v1744_v12  ;;  %v198_v11 = vsel %vm197_vm0, %v1736_v10, %v1777_v33  ;;  %v204_v26 = vsel %vm197_vm0, %v1777_v33, %v1736_v10 }
  0xdc   :  { %v2076_v0 = vrot.slane %v1100_v50, %v1937_v60  ;;  %v203_v12 = vsel %vm197_vm0, %v1758_v18, %v1783_v35  ;;  %v206_v10 = vsel %vm197_vm0, %v1785_v36, %v1760_v21  ;;  %v1088_v18 = vrot.slane %v1538_v15, %v2004_v55 }
  0xdd   :  { %v2038_v25 = vpop.permute.xlu0 %524  ;;  %v2040_v48 = vpop.permute.xlu1 %518  ;;  %v2099_v50 = vrot.slane %v1072_v17, %v1937_v60  ;;  %v1064_v35 = vrot.slane %v1517_v6, %v2004_v55  ;;  %v224_v21 = vmul.f32 %v1800_v41, %v207_v32  ;;  %v227_v36 = vmul.f32 %v1800_v41, %v203_v12 }
  0xde   :  { %994 = vrot.lane.b32.xlu0 %v1826_v56, %s1476_s30  ;;  %963 = vperm.xlu1 %1448, %v1434_v2   ;;  %2918 = vst [vmem:[#allocation51_spill] sm:$0xff] %v2076_v0  ;;  %v1104_v2 = vrot.slane %v1557_v22, %v2004_v55  ;;  %v223_v56 = vmul.f32 %v1800_v41, %v201_v28 }
  0xdf   :  { %2919 = vst [vmem:[#allocation52_spill] sm:$0xff] %v2099_v50  ;;  %v1080_v17 = vrot.slane %v1509_v4, %v2004_v55  ;;  %v202_v6 = vsel %vm197_vm0, %v1771_v29, %v1791_v38  ;;  %v228_v15 = vmul.f32 %v1800_v41, %v209_v13  ;;  %v219_v22 = vmul.f32 %v1800_v41, %v199_v44 }
  0xe0   :  { %v220_v28 = vmul.f32 %v1800_v41, %v205_v34  ;;  %v208_v32 = vsel %vm197_vm0, %v1791_v38, %v1771_v29  ;;  %v217_v4 = vmul.f32 %v1800_v41, %v198_v11  ;;  %v218_v12 = vmul.f32 %v1800_v41, %v204_v26 }
  0xe1   :  { %v2094_v33 = vpop.permute.xlu0 %528  ;;  %v2096_v5 = vpop.permute.xlu1 %522  ;;  %v2138_v44 = vrot.slane %v1064_v35, %v1937_v60  ;;  %v2141_v34 = vrot.slane %v1104_v2, %v1937_v60  ;;  %v222_v29 = vmul.f32 %v1800_v41, %v206_v10  ;;  %v235_v38 = vadd.f32 %v223_v56, %v165_v24 }
  0xe2   :  { %998 = vrot.lane.b32.xlu0 %v1837_v23, %s1476_s30  ;;  %992 = vrot.lane.b32.xlu1 %v1841_v43, %s1476_s30  ;;  %v221_v23 = vmul.f32 %v1800_v41, %v200_v30  ;;  %v2135_v43 = vrot.slane %v1088_v18, %v1937_v60  ;;  %v236_v11 = vadd.f32 %v224_v21, %v166_v59  ;;  %v2942_v18 = vld [vmem:[#allocation34_spill] sm:$0xff] }
  0xe3   :  { %2920 = vst [vmem:[#allocation53_spill] sm:$0xff] %v2141_v34  ;;  %v239_v26 = vadd.f32 %v227_v36, %v169_v16  ;;  %v2147_v30 = vrot.slane %v1080_v17, %v1937_v60  ;;  %v240_v0 = vadd.f32 %v228_v15, %v170_v27  ;;  %v231_v35 = vadd.f32 %v219_v22, %v161_v19 }
  0xe4   :  { %v232_v2 = vadd.f32 %v220_v28, %v162_v31  ;;  %v230_v34 = vadd.f32 %v218_v12, %v160_v14  ;;  %v229_v10 = vadd.f32 %v217_v4, %v159_v54  ;;  %v233_v56 = vadd.f32 %v221_v23, %v163_v9 }
  0xe5   :  { %v2130_v50 = vpop.permute.xlu0 %532  ;;  %v2132_v13 = vpop.permute.xlu1 %526  ;;  %v225_v59 = vmul.f32 %v1800_v41, %v202_v6  ;;  %v266_v24 = vsel %vm265_vm1, %v1798_v40, %v1845_v1  ;;  %v272_v16 = vsel %vm265_vm1, %v1845_v1, %v1798_v40  ;;  %v234_v31 = vadd.f32 %v222_v29, %v164_v61  ;;  %v2921_v61 = vld [vmem:[#allocation27_spill] sm:$0xff] }
  0xe6   :  { %1002 = vrot.lane.b32.xlu0 %v1854_v53, %s1476_s30  ;;  %996 = vrot.lane.b32.xlu1 %v1856_v57, %s1476_s30  ;;  %v226_v23 = vmul.f32 %v1800_v41, %v208_v32  ;;  %v268_v14 = vsel %vm265_vm1, %v1810_v46, %v1871_v51  ;;  %v274_v54 = vsel %vm265_vm1, %v1871_v51, %v1810_v46  ;;  %v2943_v57 = vld [vmem:[#allocation10_spill] sm:$0xff] }
  0xe7   :  { %v269_v1 = vsel %vm265_vm1, %v1819_v52, %v1859_v58  ;;  %v275_v40 = vsel %vm265_vm1, %v1859_v58, %v1819_v52  ;;  %v271_v41 = vsel %vm265_vm1, %v1835_v3, %v1873_v62  ;;  %v277_v46 = vsel %vm265_vm1, %v1873_v62, %v1835_v3  ;;  %v2922_v58 = vld [vmem:[#allocation23_spill] sm:$0xff]  ;;  %v2923_v52 = vld [vmem:[#allocation17_spill] sm:$0xff] }
  0xe8   :  { %v291_v51 = vmul.f32 %v1900_v63, %v269_v1  ;;  %v292_v9 = vmul.f32 %v1900_v63, %v275_v40  ;;  %v267_v21 = vsel %vm265_vm1, %v2923_v52, %v2922_v58  ;;  %v273_v36 = vsel %vm265_vm1, %v2922_v58, %v2923_v52  ;;  %v2924_v40 = vld [vmem:[#allocation30_spill] sm:$0xff] }
  0xe9   :  { %v2163_v27 = vpop.permute.xlu0 %536  ;;  %v2165_v19 = vpop.permute.xlu1 %530  ;;  %v295_v17 = vmul.f32 %v1900_v63, %v271_v41  ;;  %v296_v62 = vmul.f32 %v1900_v63, %v277_v46  ;;  %v287_v15 = vmul.f32 %v1900_v63, %v267_v21  ;;  %v288_v22 = vmul.f32 %v1900_v63, %v273_v36  ;;  %v2925_v41 = vld [vmem:[#allocation20_spill] sm:$0xff] }
  0xea   :  { %1006 = vrot.lane.b32.xlu0 %v1861_v45, %s1476_s30  ;;  %1000 = vrot.lane.b32.xlu1 %v2921_v61, %s1476_s30  ;;  %v285_v28 = vmul.f32 %v1900_v63, %v266_v24  ;;  %v286_v32 = vmul.f32 %v1900_v63, %v272_v16  ;;  %v289_v4 = vmul.f32 %v1900_v63, %v268_v14  ;;  %v2926_v14 = vld [vmem:[#allocation29_spill] sm:$0xff] }
  0xeb   :  { %v290_v12 = vmul.f32 %v1900_v63, %v274_v54  ;;  %v237_v29 = vadd.f32 %v225_v59, %v2058_v8  ;;  %v238_v1 = vadd.f32 %v226_v23, %v2061_v20  ;;  %v270_v46 = vsel %vm265_vm1, %v2925_v41, %v2924_v40  ;;  %v1435_v8 = vld [vmem:[%s2814_s1 + $0x58] sm:$0xff] }
  0xec   :  { %v276_v24 = vsel %vm265_vm1, %v2924_v40, %v2925_v41  ;;  %v303_v16 = vadd.f32 %v291_v51, %v235_v38  ;;  %v304_v58 = vadd.f32 %v292_v9, %v236_v11  ;;  %v307_v20 = vadd.f32 %v295_v17, %v239_v26  ;;  %v2927_v9 = vld [vmem:[#allocation44_spill] sm:$0xff]  ;;  %v2928_v40 = vld [vmem:[#allocation38_spill] sm:$0xff] }
  0xed   :  { %v2208_v3 = vpop.permute.xlu0 %556  ;;  %v2210_v6 = vpop.permute.xlu1 %534  ;;  %v308_v59 = vadd.f32 %v296_v62, %v240_v0  ;;  %v293_v23 = vmul.f32 %v1900_v63, %v270_v46  ;;  %v294_v54 = vmul.f32 %v1900_v63, %v276_v24  ;;  %v299_v36 = vadd.f32 %v287_v15, %v231_v35  ;;  %v2929_v17 = vld [vmem:[#allocation42_spill] sm:$0xff]  ;;  %v2930_v62 = vld [vmem:[#allocation36_spill] sm:$0xff]  ;;  %v2935_v46 = vld [vmem:[#allocation37_spill] sm:$0xff] }
  0xee   :  { %1010 = vrot.lane.b32.xlu0 %v1879_v49, %s1476_s30  ;;  %1004 = vrot.lane.b32.xlu1 %v2926_v14, %s1476_s30  ;;  %v300_v38 = vadd.f32 %v288_v22, %v232_v2  ;;  %v298_v11 = vadd.f32 %v286_v32, %v230_v34  ;;  %v297_v51 = vadd.f32 %v285_v28, %v229_v10  ;;  %v2931_v2 = vld [vmem:[#allocation46_spill] sm:$0xff]  ;;  %v2932_v10 = vld [vmem:[#allocation40_spill] sm:$0xff]  ;;  %v2934_v22 = vld [vmem:[#allocation43_spill] sm:$0xff] }
  0xef   :  { %v337_v41 = vsel %vm333_vm2, %v2928_v40, %v2927_v9  ;;  %v343_v0 = vsel %vm333_vm2, %v2927_v9, %v2928_v40  ;;  %v301_v63 = vadd.f32 %v289_v4, %v233_v56  ;;  %v302_v26 = vadd.f32 %v290_v12, %v234_v31  ;;  %v2933_v31 = vld [vmem:[#allocation32_spill] sm:$0xff]  ;;  %v2936_v24 = vld [vmem:[#allocation31_spill] sm:$0xff] }
  0xf0   :  { %v335_v35 = vsel %vm333_vm2, %v2930_v62, %v2929_v17  ;;  %v341_v34 = vsel %vm333_vm2, %v2929_v17, %v2930_v62  ;;  %v339_v15 = vsel %vm333_vm2, %v2932_v10, %v2931_v2  ;;  %v345_v56 = vsel %vm333_vm2, %v2931_v2, %v2932_v10  ;;  %v2940_v2 = vld [vmem:[#allocation41_spill] sm:$0xff]  ;;  %v2941_v10 = vld [vmem:[#allocation35_spill] sm:$0xff] }
  0xf1   :  { %v2237_v52 = vpop.permute.xlu0 %585  ;;  %v2239_v21 = vpop.permute.xlu1 %538  ;;  %v355_v28 = vmul.f32 %v2934_v22, %v335_v35  ;;  %v356_v32 = vmul.f32 %v2934_v22, %v341_v34  ;;  %v305_v4 = vadd.f32 %v293_v23, %v237_v29  ;;  %v306_v12 = vadd.f32 %v294_v54, %v238_v1  ;;  %v2937_v29 = vld [vmem:[#allocation39_spill] sm:$0xff]  ;;  %v2938_v1 = vld [vmem:[#allocation33_spill] sm:$0xff] }
  0xf2   :  { %1030 = vperm.xlu0 %1447, %v1435_v8   ;;  %1008 = vrot.lane.b32.xlu1 %v2933_v31, %s1476_s30  ;;  %v334_v8 = vsel %vm333_vm2, %v2936_v24, %v2935_v46  ;;  %v340_v9 = vsel %vm333_vm2, %v2935_v46, %v2936_v24  ;;  %v359_v40 = vmul.f32 %v2934_v22, %v337_v41 }
  0xf3   :  { %v360_v17 = vmul.f32 %v2934_v22, %v343_v0  ;;  %v336_v23 = vsel %vm333_vm2, %v2938_v1, %v2937_v29  ;;  %v342_v54 = vsel %vm333_vm2, %v2937_v29, %v2938_v1  ;;  %v363_v34 = vmul.f32 %v2934_v22, %v339_v15  ;;  %v2939_v0 = vld [vmem:[#allocation47_spill] sm:$0xff]  ;;  %v1436_v29 = vld [vmem:[%s2814_s1 + $0x60] sm:$0xff] }
  0xf4   :  { %v364_v41 = vmul.f32 %v2934_v22, %v345_v56  ;;  %v338_v46 = vsel %vm333_vm2, %v2941_v10, %v2940_v2  ;;  %v344_v24 = vsel %vm333_vm2, %v2940_v2, %v2941_v10  ;;  %v353_v15 = vmul.f32 %v2934_v22, %v334_v8 }
  0xf5   :  { %v2279_v62 = vpop.permute.xlu0 %589  ;;  %v2281_v35 = vpop.permute.xlu1 %583  ;;  %v354_v56 = vmul.f32 %v2934_v22, %v340_v9  ;;  %v367_v1 = vadd.f32 %v355_v28, %v299_v36  ;;  %v368_v49 = vadd.f32 %v356_v32, %v300_v38  ;;  %v357_v45 = vmul.f32 %v2934_v22, %v336_v23  ;;  %v2944_v38 = vld [vmem:[#allocation15_spill] sm:$0xff]  ;;  %v2945_v32 = vld [vmem:[#allocation48_spill] sm:$0xff] }
  0xf6   :  { %1196 = vrot.lane.b32.xlu0 %v2939_v0, %s1474_s25  ;;  %1012 = vrot.lane.b32.xlu1 %v2942_v18, %s1476_s30  ;;  %v358_v53 = vmul.f32 %v2934_v22, %v342_v54  ;;  %v371_v14 = vadd.f32 %v359_v40, %v303_v16  ;;  %v372_v61 = vadd.f32 %v360_v17, %v304_v58  ;;  %v2946_v16 = vld [vmem:[#allocation12_spill] sm:$0xff]  ;;  %v2950_v54 = vld [vmem:[#allocation5_spill] sm:$0xff]  ;;  %v2953_v0 = vld [vmem:[#allocation11_spill] sm:$0xff] }
  0xf7   :  { %v361_v8 = vmul.f32 %v2934_v22, %v338_v46  ;;  %v362_v9 = vmul.f32 %v2934_v22, %v344_v24  ;;  %v375_v18 = vadd.f32 %v363_v34, %v307_v20  ;;  %v376_v31 = vadd.f32 %v364_v41, %v308_v59  ;;  %v2947_v40 = vld [vmem:[#allocation16_spill] sm:$0xff]  ;;  %v2949_v59 = vld [vmem:[#allocation14_spill] sm:$0xff]  ;;  %v2951_v41 = vld [vmem:[#allocation9_spill] sm:$0xff] }
  0xf8   :  { %v498_v36 = vmul.f32 %v1998_v37, %v2943_v57  ;;  %v499_v28 = vmul.f32 %v1998_v37, %v2944_v38  ;;  %v502_v58 = vmul.f32 %v1998_v37, %v2946_v16  ;;  %v503_v17 = vmul.f32 %v1998_v37, %v2947_v40  ;;  %v2948_v23 = vld [vmem:[#allocation8_spill] sm:$0xff] }
  0xf9   :  { %v2312_v2 = vpop.permute.xlu0 %593  ;;  %v2314_v10 = vpop.permute.xlu1 %587  ;;  %v494_v20 = vmul.f32 %v1998_v37, %v2948_v23  ;;  %v495_v22 = vmul.f32 %v1998_v37, %v2949_v59  ;;  %v366_v57 = vadd.f32 %v354_v56, %v298_v11  ;;  %v492_v34 = vmul.f32 %v1998_v37, %v2950_v54 }
  0xfa   :  { %1200 = vrot.lane.b32.xlu0 %v2945_v32, %s1474_s25  ;;  %1169 = vperm.xlu1 %1448, %v1436_v29   ;;  %v493_v46 = vmul.f32 %v1998_v37, %v2951_v41  ;;  %v365_v24 = vadd.f32 %v353_v15, %v297_v51  ;;  %v369_v40 = vadd.f32 %v357_v45, %v301_v63  ;;  %v2952_v32 = vld [vmem:[#allocation6_spill] sm:$0xff]  ;;  %v1438_v45 = vld [vmem:[%s2814_s1 + $0x70] sm:$0xff] }
  0xfb   :  { %v370_v29 = vadd.f32 %v358_v53, %v302_v26  ;;  %v496_v23 = vmul.f32 %v1998_v37, %v2952_v32  ;;  %v497_v59 = vmul.f32 %v1998_v37, %v2953_v0  ;;  %v2344_v11 = vadd.f32 %v498_v36, %v371_v14  ;;  %v2954_v26 = vld [vmem:[#allocation7_spill] sm:$0xff] }
  0xfc   :  { %v2346_v56 = vadd.f32 %v499_v28, %v372_v61  ;;  %v373_v51 = vadd.f32 %v361_v8, %v305_v4  ;;  %v374_v15 = vadd.f32 %v362_v9, %v306_v12  ;;  %v2350_v54 = vadd.f32 %v502_v58, %v375_v18  ;;  %v2955_v4 = vld [vmem:[#allocation13_spill] sm:$0xff] }
  0xfd   :  { %v2336_v38 = vpop.permute.xlu0 %597  ;;  %v2338_v16 = vpop.permute.xlu1 %591  ;;  %v2352_v41 = vadd.f32 %v503_v17, %v376_v31  ;;  %v506_v53 = vadd.f32 %v494_v20, %v367_v1  ;;  %v507_v14 = vadd.f32 %v495_v22, %v368_v49  ;;  %v505_v61 = vadd.f32 %v493_v46, %v366_v57  ;;  %v2956_v31 = vld [vmem:[#allocation45_spill] sm:$0xff]  ;;  %v1437_v57 = vld [vmem:[%s2814_s1 + $0x68] sm:$0xff] }
  0xfe   :  { %1204 = vrot.lane.b32.xlu0 %v1986_v42, %s1474_s25  ;;  %1198 = vrot.lane.b32.xlu1 %v2001_v47, %s1474_s25  ;;  %v504_v63 = vadd.f32 %v492_v34, %v365_v24  ;;  %v500_v0 = vmul.f32 %v1998_v37, %v2954_v26  ;;  %v501_v18 = vmul.f32 %v1998_v37, %v2955_v4  ;;  %v2957_v58 = vld [vmem:[#allocation49_spill] sm:$0xff] }
  0xff   :  { %v540_v12 = vsel %vm197_vm0, %v2956_v31, %v2094_v33  ;;  %v546_v8 = vsel %vm197_vm0, %v2094_v33, %v2956_v31  ;;  %v508_v9 = vadd.f32 %v496_v23, %v369_v40  ;;  %v509_v36 = vadd.f32 %v497_v59, %v370_v29 }
 0x100   :  { %v543_v37 = vsel %vm197_vm0, %v2096_v5, %v2210_v6  ;;  %v549_v28 = vsel %vm197_vm0, %v2210_v6, %v2096_v5  ;;  %v542_v17 = vsel %vm197_vm0, %v2957_v58, %v2130_v50  ;;  %v548_v20 = vsel %vm197_vm0, %v2130_v50, %v2957_v58 }
 0x101   :  { %v602_v1 = vpop.permute.xlu0 %601  ;;  %v2371_v49 = vpop.permute.xlu1 %595  ;;  %v541_v5 = vsel %vm197_vm0, %v2040_v48, %v2165_v19  ;;  %v547_v6 = vsel %vm197_vm0, %v2165_v19, %v2040_v48  ;;  %v544_v22 = vsel %vm197_vm0, %v2038_v25, %v2163_v27  ;;  %v550_v50 = vsel %vm197_vm0, %v2163_v27, %v2038_v25 }
 0x102   :  { %v610_v32 = vsel %vm265_vm1, %v2279_v62, %v602_v1  ;;  %v616_v33 = vsel %vm265_vm1, %v602_v1, %v2279_v62  ;;  %1303 = vperm.xlu0 %1447, %v1438_v45   ;;  %v2958_v62 = vld [vmem:[#allocation50_spill] sm:$0xff]  ;;  %v561_v34 = vmul.f32 %v2208_v3, %v541_v5  ;;  %v562_v48 = vmul.f32 %v2208_v3, %v547_v6 }
 0x103   :  { %1202 = vrot.lane.b32.xlu1 %v2958_v62, %s1474_s25  ;;  %v565_v19 = vmul.f32 %v2208_v3, %v543_v37  ;;  %v566_v46 = vmul.f32 %v2208_v3, %v549_v28  ;;  %v545_v24 = vsel %vm197_vm0, %v2132_v13, %v2239_v21  ;;  %v551_v25 = vsel %vm197_vm0, %v2239_v21, %v2132_v13  ;;  %v2959_v13 = vld [vmem:[#allocation51_spill] sm:$0xff] }
 0x104   :  { %v559_v21 = vmul.f32 %v2208_v3, %v540_v12  ;;  %v560_v26 = vmul.f32 %v2208_v3, %v546_v8  ;;  %v563_v4 = vmul.f32 %v2208_v3, %v542_v17  ;;  %v569_v31 = vmul.f32 %v2208_v3, %v545_v24 }
 0x105   :  { %v606_v27 = vpop.permute.xlu0 %605  ;;  %v600_v40 = vpop.permute.xlu1 %599  ;;  %v570_v1 = vmul.f32 %v2208_v3, %v551_v25  ;;  %v567_v37 = vmul.f32 %v2208_v3, %v544_v22  ;;  %v568_v28 = vmul.f32 %v2208_v3, %v550_v50  ;;  %v573_v5 = vadd.f32 %v561_v34, %v506_v53 }
 0x106   :  { %v612_v29 = vsel %vm265_vm1, %v2312_v2, %v606_v27  ;;  %v618_v23 = vsel %vm265_vm1, %v606_v27, %v2312_v2  ;;  %v609_v59 = vsel %vm265_vm1, %v2314_v10, %v600_v40  ;;  %v615_v45 = vsel %vm265_vm1, %v600_v40, %v2314_v10  ;;  %1206 = vrot.lane.b32.xlu0 %v2959_v13, %s1474_s25  ;;  %v1439_v10 = vld [vmem:[%s2814_s1 + $0x78] sm:$0xff]  ;;  %s1477_s1 = smov [#allocation2]  }
 0x107   :  { %1236 = vperm.xlu1 %1448, %v1437_v57   ;;  %v564_v2 = vmul.f32 %v2208_v3, %v548_v20  ;;  %v574_v8 = vadd.f32 %v562_v48, %v507_v14  ;;  %v512_v6 = vadd.f32 %v500_v0, %v373_v51  ;;  %v513_v17 = vadd.f32 %v501_v18, %v374_v15  ;;  %v2960_v3 = vld [vmem:[#allocation52_spill] sm:$0xff] }
 0x108   :  { %v577_v20 = vadd.f32 %v565_v19, %v2344_v11  ;;  %v578_v57 = vadd.f32 %v566_v46, %v2346_v56  ;;  %v572_v53 = vadd.f32 %v560_v26, %v505_v61  ;;  %v571_v14 = vadd.f32 %v559_v21, %v504_v63 }
 0x109   :  { %v651_v58 = vpop.permute.xlu0 %650  ;;  %v604_v12 = vpop.permute.xlu1 %603  ;;  %v575_v51 = vadd.f32 %v563_v4, %v508_v9  ;;  %v576_v15 = vadd.f32 %v564_v2, %v509_v36  ;;  %v581_v11 = vadd.f32 %v569_v31, %v2350_v54  ;;  %v582_v56 = vadd.f32 %v570_v1, %v2352_v41 }
 0x10a   :  { %v611_v24 = vsel %vm265_vm1, %v2338_v16, %v604_v12  ;;  %v617_v22 = vsel %vm265_vm1, %v604_v12, %v2338_v16  ;;  %1210 = vrot.lane.b32.xlu0 %v2960_v3, %s1474_s25  ;;  %v579_v0 = vadd.f32 %v567_v37, %v512_v6  ;;  %v580_v18 = vadd.f32 %v568_v28, %v513_v17 }
 0x10b   :  { %1370 = vperm.xlu1 %1448, %v1439_v10   ;;  %v608_v50 = vsel %vm265_vm1, %v2237_v52, %v2336_v38  ;;  %v614_v16 = vsel %vm265_vm1, %v2336_v38, %v2237_v52  ;;  %v607_v61 = vsel %vm265_vm1, %v2281_v35, %v2371_v49  ;;  %v613_v54 = vsel %vm265_vm1, %v2371_v49, %v2281_v35 }
 0x10c   :  { %v2962_v10 = vrot.slane %v1522_v7, %v2004_v55 }
 0x10d   :  { %v655_v41 = vpop.permute.xlu0 %654  ;;  %v624_v63 = vpop.permute.xlu1 %623 }
 0x10e   :  { %1214 = vrot.lane.b32.xlu0 %v2135_v43, %s1474_s25  ;;  %v632_v9 = vmul.f32 %v624_v63, %v610_v32  ;;  %v633_v36 = vmul.f32 %v624_v63, %v616_v33  ;;  %v636_v34 = vmul.f32 %v624_v63, %v612_v29  ;;  %v637_v48 = vmul.f32 %v624_v63, %v618_v23  ;;  %v2961_v23 = vld [vmem:[#allocation53_spill] sm:$0xff] }
 0x10f   :  { %1208 = vrot.lane.b32.xlu1 %v2138_v44, %s1474_s25  ;;  %v628_v52 = vmul.f32 %v624_v63, %v608_v50  ;;  %v629_v38 = vmul.f32 %v624_v63, %v614_v16  ;;  %v626_v19 = vmul.f32 %v624_v63, %v607_v61  ;;  %v627_v46 = vmul.f32 %v624_v63, %v613_v54 }
 0x110   :  { %v644_v25 = vadd.f32 %v632_v9, %v577_v20  ;;  %v645_v27 = vadd.f32 %v633_v36, %v578_v57  ;;  %v2485_v40 = vadd.f32 %v636_v34, %v581_v11  ;;  %v2487_v35 = vadd.f32 %v637_v48, %v582_v56  ;;  %v2963_v57 = vld [vmem:[#allocation47_spill] sm:$0xff] }
 0x111   :  { %v659_v49 = vpop.permute.xlu0 %658  ;;  %v653_v21 = vpop.permute.xlu1 %652  ;;  %v640_v26 = vadd.f32 %v628_v52, %v573_v5  ;;  %v641_v32 = vadd.f32 %v629_v38, %v574_v8  ;;  %v639_v33 = vadd.f32 %v627_v46, %v572_v53  ;;  %v638_v29 = vadd.f32 %v626_v19, %v571_v14 }
 0x112   :  { %1218 = vrot.lane.b32.xlu0 %v2961_v23, %s1474_s25  ;;  %v630_v4 = vmul.f32 %v624_v63, %v609_v59  ;;  %v631_v2 = vmul.f32 %v624_v63, %v615_v45  ;;  %v634_v31 = vmul.f32 %v624_v63, %v611_v24  ;;  %v635_v1 = vmul.f32 %v624_v63, %v617_v22 }
 0x113   :  { %1212 = vrot.lane.b32.xlu1 %v2147_v30, %s1474_s25  ;;  %v2497_v37 = vrot.slane %v2962_v10, %v1937_v60 }
 0x114   :  { %v642_v28 = vadd.f32 %v630_v4, %v575_v51  ;;  %v643_v12 = vadd.f32 %v631_v2, %v576_v15  ;;  %v646_v5 = vadd.f32 %v634_v31, %v579_v0  ;;  %v647_v8 = vadd.f32 %v635_v1, %v580_v18  ;;  %v2964_v15 = vld [vmem:[#allocation48_spill] sm:$0xff] }
 0x115   :  { %v663_v6 = vpop.permute.xlu0 %662  ;;  %v657_v17 = vpop.permute.xlu1 %656 }
 0x116   :  { %v674_v59 = vsel %vm333_vm2, %v651_v58, %v663_v6  ;;  %v680_v45 = vsel %vm333_vm2, %v663_v6, %v651_v58  ;;  %1265 = vrot.lane.b32.xlu0 %v2001_v47, %s1475_s29 }
 0x117   :  { %1216 = vrot.lane.b32.xlu1 %v2497_v37, %s1474_s25  ;;  %s1414_s25 = sshll.u32 %s1477_s1, 4  ;;  %s1415_s25 = int_to_ptr.vmem [resolvable:$true] %s1414_s25 }
 0x118   :  { %p1454_p1 = scmp.lt.s32.totalorder %s1415_s25, %s1415_s25 }
 0x119   :  { %v667_v7 = vpop.permute.xlu0 %666  ;;  %v661_v60 = vpop.permute.xlu1 %660 }
 0x11a   :  { %v676_v55 = vsel %vm333_vm2, %v655_v41, %v667_v7  ;;  %v682_v20 = vsel %vm333_vm2, %v667_v7, %v655_v41  ;;  %1269 = vrot.lane.b32.xlu0 %v2958_v62, %s1475_s29 }
 0x11b   :  { %1263 = vrot.lane.b32.xlu1 %v2963_v57, %s1475_s29 }
 0x11d   :  { %v671_v58 = vpop.permute.xlu0 %670  ;;  %v665_v24 = vpop.permute.xlu1 %664 }
 0x11e   :  { %v678_v22 = vsel %vm333_vm2, %v659_v49, %v671_v58  ;;  %v684_v53 = vsel %vm333_vm2, %v671_v58, %v659_v49  ;;  %v675_v14 = vsel %vm333_vm2, %v653_v21, %v665_v24  ;;  %v681_v51 = vsel %vm333_vm2, %v665_v24, %v653_v21  ;;  %1273 = vrot.lane.b32.xlu0 %v2959_v13, %s1475_s29  ;;  %v2970_v24 = vld [vmem:[#allocation29_spill] sm:$0xff] }
 0x11f   :  { %1267 = vrot.lane.b32.xlu1 %v2964_v15, %s1475_s29 }
 0x121   :  { %v691_v11 = vpop.permute.xlu0 %690  ;;  %v669_v56 = vpop.permute.xlu1 %668 }
 0x122   :  { %v677_v0 = vsel %vm333_vm2, %v657_v17, %v669_v56  ;;  %v683_v18 = vsel %vm333_vm2, %v669_v56, %v657_v17  ;;  %1277 = vrot.lane.b32.xlu0 %v2960_v3, %s1475_s29  ;;  %v695_v50 = vmul.f32 %v691_v11, %v675_v14  ;;  %v696_v16 = vmul.f32 %v691_v11, %v681_v51 }
 0x123   :  { %v699_v61 = vmul.f32 %v691_v11, %v677_v0  ;;  %v700_v54 = vmul.f32 %v691_v11, %v683_v18  ;;  %1271 = vrot.lane.b32.xlu1 %v1986_v42, %s1475_s29  ;;  %v693_v41 = vmul.f32 %v691_v11, %v674_v59  ;;  %v694_v63 = vmul.f32 %v691_v11, %v680_v45  ;;  %v2966_v45 = vld [vmem:[#allocation32_spill] sm:$0xff] }
 0x124   :  { %v707_v9 = vadd.f32 %v695_v50, %v640_v26  ;;  %v708_v36 = vadd.f32 %v696_v16, %v641_v32  ;;  %v697_v34 = vmul.f32 %v691_v11, %v676_v55  ;;  %v698_v48 = vmul.f32 %v691_v11, %v682_v20  ;;  %v2968_v20 = vld [vmem:[#allocation34_spill] sm:$0xff] }
 0x125   :  { %v711_v52 = vadd.f32 %v699_v61, %v644_v25  ;;  %v712_v38 = vadd.f32 %v700_v54, %v645_v27  ;;  %v857_v19 = vpop.permute.xlu0 %856  ;;  %v673_v46 = vpop.permute.xlu1 %672  ;;  %v706_v49 = vadd.f32 %v694_v63, %v639_v33  ;;  %v705_v21 = vadd.f32 %v693_v41, %v638_v29  ;;  %v2973_v63 = vld [vmem:[#allocation19_spill] sm:$0xff] }
 0x126   :  { %v679_v4 = vsel %vm333_vm2, %v661_v60, %v673_v46  ;;  %v685_v2 = vsel %vm333_vm2, %v673_v46, %v661_v60  ;;  %1281 = vrot.lane.b32.xlu0 %v2135_v43, %s1475_s29  ;;  %v709_v31 = vadd.f32 %v697_v34, %v642_v28  ;;  %v710_v26 = vadd.f32 %v698_v48, %v643_v12  ;;  %v2965_v28 = vld [vmem:[#allocation25_spill] sm:$0xff]  ;;  %v2967_v60 = vld [vmem:[#allocation27_spill] sm:$0xff]  ;;  %v2974_v48 = vld [vmem:[#allocation26_spill] sm:$0xff] }
 0x127   :  { %v703_v32 = vmul.f32 %v691_v11, %v679_v4  ;;  %v704_v1 = vmul.f32 %v691_v11, %v685_v2  ;;  %1275 = vrot.lane.b32.xlu1 %v2138_v44, %s1475_s29  ;;  %v701_v25 = vmul.f32 %v691_v11, %v678_v22  ;;  %v702_v27 = vmul.f32 %v691_v11, %v684_v53  ;;  %v2972_v53 = vld [vmem:[#allocation24_spill] sm:$0xff]  ;;  %v2975_v4 = vld [vmem:[#allocation21_spill] sm:$0xff] }
 0x129   :  { %v715_v33 = vadd.f32 %v703_v32, %v2485_v40  ;;  %v716_v29 = vadd.f32 %v704_v1, %v2487_v35  ;;  %v861_v10 = vpop.permute.xlu0 %860  ;;  %v830_v6 = vpop.permute.xlu1 %829  ;;  %v713_v17 = vadd.f32 %v701_v25, %v646_v5  ;;  %v714_v59 = vadd.f32 %v702_v27, %v647_v8  ;;  %v2969_v40 = vld [vmem:[#allocation22_spill] sm:$0xff] }
 0x12a   :  { %1285 = vrot.lane.b32.xlu0 %v2961_v23, %s1475_s29  ;;  %v838_v12 = vmul.f32 %v830_v6, %v2965_v28  ;;  %v839_v7 = vmul.f32 %v830_v6, %v2966_v45  ;;  %v842_v55 = vmul.f32 %v830_v6, %v2967_v60  ;;  %v843_v58 = vmul.f32 %v830_v6, %v2968_v20  ;;  %v2971_v5 = vld [vmem:[#allocation18_spill] sm:$0xff] }
 0x12b   :  { %1279 = vrot.lane.b32.xlu1 %v2147_v30, %s1475_s29  ;;  %v834_v35 = vmul.f32 %v830_v6, %v2969_v40  ;;  %v835_v22 = vmul.f32 %v830_v6, %v2970_v24  ;;  %v832_v8 = vmul.f32 %v830_v6, %v2971_v5  ;;  %v833_v14 = vmul.f32 %v830_v6, %v2972_v53 }
 0x12c   :  { %v850_v51 = vadd.f32 %v838_v12, %v711_v52  ;;  %v851_v11 = vadd.f32 %v839_v7, %v712_v38  ;;  %v2557_v56 = vadd.f32 %v842_v55, %v715_v33  ;;  %v2559_v0 = vadd.f32 %v843_v58, %v716_v29  ;;  %v2976_v38 = vld [vmem:[#allocation28_spill] sm:$0xff] }
 0x12d   :  { %v865_v18 = vpop.permute.xlu0 %864  ;;  %v859_v50 = vpop.permute.xlu1 %858  ;;  %v846_v16 = vadd.f32 %v834_v35, %v707_v9  ;;  %v847_v61 = vadd.f32 %v835_v22, %v708_v36  ;;  %v845_v54 = vadd.f32 %v833_v14, %v706_v49  ;;  %v844_v41 = vadd.f32 %v832_v8, %v705_v21 }
 0x12e   :  { %1332 = vrot.lane.b32.xlu0 %v2001_v47, %s1476_s30  ;;  %v836_v34 = vmul.f32 %v830_v6, %v2973_v63  ;;  %v837_v46 = vmul.f32 %v830_v6, %v2974_v48  ;;  %v840_v52 = vmul.f32 %v830_v6, %v2975_v4  ;;  %v841_v2 = vmul.f32 %v830_v6, %v2976_v38 }
 0x12f   :  { %1283 = vrot.lane.b32.xlu1 %v2497_v37, %s1475_s29  ;;  %s1449_s29 = scalar_lea.vmem %s1415_s25, 1536 }
 0x130   :  { %v848_v32 = vadd.f32 %v836_v34, %v709_v31  ;;  %v849_v1 = vadd.f32 %v837_v46, %v710_v26  ;;  %v852_v9 = vadd.f32 %v840_v52, %v713_v17  ;;  %v853_v36 = vadd.f32 %v841_v2, %v714_v59  ;;  %p1450_p0 = scmp.ne.s32.totalorder %s1415_s25, %s1449_s29  ;;  %p1455_p2 = scmp.lt.s32.totalorder %s1449_s29, %s1449_s29 }
 0x131   :  { %v869_v49 = vpop.permute.xlu0 %868  ;;  %v863_v21 = vpop.permute.xlu1 %862 }
 0x132   :  { %v880_v25 = vsel %vm197_vm0, %v857_v19, %v869_v49  ;;  %v886_v27 = vsel %vm197_vm0, %v869_v49, %v857_v19  ;;  %1336 = vrot.lane.b32.xlu0 %v2958_v62, %s1476_s30  ;;  %p1456_p3 = por %p1455_p2, %p1454_p1 }
 0x133   :  { %1330 = vrot.lane.b32.xlu1 %v2963_v57, %s1476_s30 }
 0x134   :  { %p1457_p4 = pnand %p1456_p3, %p1450_p0 }
 0x135   :  { %v873_v33 = vpop.permute.xlu0 %872  ;;  %v867_v29 = vpop.permute.xlu1 %866 }
 0x136   :  { %v882_v31 = vsel %vm197_vm0, %v861_v10, %v873_v33  ;;  %v888_v26 = vsel %vm197_vm0, %v873_v33, %v861_v10  ;;  %1340 = vrot.lane.b32.xlu0 %v2959_v13, %s1476_s30 }
 0x137   :  { %1334 = vrot.lane.b32.xlu1 %v2964_v15, %s1476_s30 }
 0x139   :  { %v877_v19 = vpop.permute.xlu0 %876  ;;  %v871_v6 = vpop.permute.xlu1 %870 }
 0x13a   :  { %v884_v17 = vsel %vm197_vm0, %v865_v18, %v877_v19  ;;  %v890_v59 = vsel %vm197_vm0, %v877_v19, %v865_v18  ;;  %v881_v28 = vsel %vm197_vm0, %v859_v50, %v871_v6  ;;  %v887_v10 = vsel %vm197_vm0, %v871_v6, %v859_v50  ;;  %1344 = vrot.lane.b32.xlu0 %v2960_v3, %s1476_s30 }
 0x13b   :  { %1338 = vrot.lane.b32.xlu1 %v1986_v42, %s1476_s30 }
 0x13d   :  { %v897_v12 = vpop.permute.xlu0 %896  ;;  %v875_v45 = vpop.permute.xlu1 %874 }
 0x13e   :  { %v883_v7 = vsel %vm197_vm0, %v863_v21, %v875_v45  ;;  %v889_v60 = vsel %vm197_vm0, %v875_v45, %v863_v21  ;;  %1348 = vrot.lane.b32.xlu0 %v2135_v43, %s1476_s30  ;;  %v901_v55 = vmul.f32 %v897_v12, %v881_v28  ;;  %v902_v20 = vmul.f32 %v897_v12, %v887_v10 }
 0x13f   :  { %v905_v58 = vmul.f32 %v897_v12, %v883_v7  ;;  %v906_v40 = vmul.f32 %v897_v12, %v889_v60  ;;  %1342 = vrot.lane.b32.xlu1 %v2138_v44, %s1476_s30  ;;  %v899_v35 = vmul.f32 %v897_v12, %v880_v25  ;;  %v900_v24 = vmul.f32 %v897_v12, %v886_v27 }
 0x140   :  { %v2605_v22 = vadd.f32 %v901_v55, %v846_v16  ;;  %v2607_v5 = vadd.f32 %v902_v20, %v847_v61  ;;  %v903_v8 = vmul.f32 %v897_v12, %v882_v31  ;;  %v904_v53 = vmul.f32 %v897_v12, %v888_v26 }
 0x141   :  { %v917_v14 = vadd.f32 %v905_v58, %v850_v51  ;;  %v918_v18 = vadd.f32 %v906_v40, %v851_v11  ;;  %v926_v50 = vpop.permute.xlu0 %925  ;;  %v879_v63 = vpop.permute.xlu1 %878  ;;  %v912_v34 = vadd.f32 %v900_v24, %v845_v54  ;;  %v911_v48 = vadd.f32 %v899_v35, %v844_v41 }
 0x142   :  { %v885_v46 = vsel %vm197_vm0, %v867_v29, %v879_v63  ;;  %v891_v4 = vsel %vm197_vm0, %v879_v63, %v867_v29  ;;  %1352 = vrot.lane.b32.xlu0 %v2961_v23, %s1476_s30  ;;  %v915_v16 = vadd.f32 %v903_v8, %v848_v32  ;;  %v916_v61 = vadd.f32 %v904_v53, %v849_v1 }
 0x143   :  { %v909_v52 = vmul.f32 %v897_v12, %v885_v46  ;;  %v910_v38 = vmul.f32 %v897_v12, %v891_v4  ;;  %1346 = vrot.lane.b32.xlu1 %v2147_v30, %s1476_s30  ;;  %v907_v51 = vmul.f32 %v897_v12, %v884_v17  ;;  %v908_v11 = vmul.f32 %v897_v12, %v890_v59 }
 0x145   :  { %v921_v54 = vadd.f32 %v909_v52, %v2557_v56  ;;  %v922_v41 = vadd.f32 %v910_v38, %v2559_v0  ;;  %v930_v2 = vpop.permute.xlu0 %929  ;;  %v924_v49 = vpop.permute.xlu1 %923  ;;  %v919_v21 = vadd.f32 %v907_v51, %v852_v9  ;;  %v920_v25 = vadd.f32 %v908_v11, %v853_v36 }
 0x147   :  { %1350 = vrot.lane.b32.xlu1 %v2497_v37, %s1476_s30 }
 0x149   :  { %v934_v32 = vpop.permute.xlu0 %933  ;;  %v928_v1 = vpop.permute.xlu1 %927 }
 0x14d   :  { %v938_v27 = vpop.permute.xlu0 %937  ;;  %v932_v33 = vpop.permute.xlu1 %931 }
 0x14e   :  { %v948_v29 = vsel %vm265_vm1, %v926_v50, %v938_v27  ;;  %v954_v31 = vsel %vm265_vm1, %v938_v27, %v926_v50 }
 0x151   :  { %v942_v56 = vpop.permute.xlu0 %941  ;;  %v936_v26 = vpop.permute.xlu1 %935 }
 0x152   :  { %v950_v0 = vsel %vm265_vm1, %v930_v2, %v942_v56  ;;  %v956_v9 = vsel %vm265_vm1, %v942_v56, %v930_v2  ;;  %v947_v36 = vsel %vm265_vm1, %v924_v49, %v936_v26  ;;  %v953_v19 = vsel %vm265_vm1, %v936_v26, %v924_v49 }
 0x155   :  { %v946_v6 = vpop.permute.xlu0 %945  ;;  %v940_v17 = vpop.permute.xlu1 %939 }
 0x156   :  { %v952_v59 = vsel %vm265_vm1, %v934_v32, %v946_v6  ;;  %v958_v28 = vsel %vm265_vm1, %v946_v6, %v934_v32  ;;  %v949_v10 = vsel %vm265_vm1, %v928_v1, %v940_v17  ;;  %v955_v12 = vsel %vm265_vm1, %v940_v17, %v928_v1 }
 0x159   :  { %v991_v45 = vpop.permute.xlu0 %990  ;;  %v944_v7 = vpop.permute.xlu1 %943 }
 0x15a   :  { %v951_v60 = vsel %vm265_vm1, %v932_v33, %v944_v7  ;;  %v957_v55 = vsel %vm265_vm1, %v944_v7, %v932_v33 }
 0x15d   :  { %v995_v20 = vpop.permute.xlu0 %994  ;;  %v964_v58 = vpop.permute.xlu1 %963 }
 0x15e   :  { %v972_v40 = vmul.f32 %v964_v58, %v950_v0  ;;  %v973_v35 = vmul.f32 %v964_v58, %v956_v9  ;;  %v976_v24 = vmul.f32 %v964_v58, %v952_v59  ;;  %v977_v8 = vmul.f32 %v964_v58, %v958_v28 }
 0x15f   :  { %v968_v53 = vmul.f32 %v964_v58, %v948_v29  ;;  %v969_v50 = vmul.f32 %v964_v58, %v954_v31  ;;  %v966_v63 = vmul.f32 %v964_v58, %v947_v36  ;;  %v967_v46 = vmul.f32 %v964_v58, %v953_v19 }
 0x160   :  { %v984_v52 = vadd.f32 %v972_v40, %v917_v14  ;;  %v985_v38 = vadd.f32 %v973_v35, %v918_v18  ;;  %v988_v51 = vadd.f32 %v976_v24, %v921_v54  ;;  %v989_v11 = vadd.f32 %v977_v8, %v922_v41 }
 0x161   :  { %v999_v4 = vpop.permute.xlu0 %998  ;;  %v993_v2 = vpop.permute.xlu1 %992  ;;  %v980_v49 = vadd.f32 %v968_v53, %v2605_v22  ;;  %v981_v32 = vadd.f32 %v969_v50, %v2607_v5  ;;  %v979_v1 = vadd.f32 %v967_v46, %v912_v34  ;;  %v978_v27 = vadd.f32 %v966_v63, %v911_v48 }
 0x162   :  { %v970_v33 = vmul.f32 %v964_v58, %v949_v10  ;;  %v971_v56 = vmul.f32 %v964_v58, %v955_v12  ;;  %v974_v26 = vmul.f32 %v964_v58, %v951_v60  ;;  %v975_v0 = vmul.f32 %v964_v58, %v957_v55 }
 0x164   :  { %v982_v31 = vadd.f32 %v970_v33, %v915_v16  ;;  %v983_v9 = vadd.f32 %v971_v56, %v916_v61  ;;  %v986_v36 = vadd.f32 %v974_v26, %v919_v21  ;;  %v987_v19 = vadd.f32 %v975_v0, %v920_v25 }
 0x165   :  { %v1003_v29 = vpop.permute.xlu0 %1002  ;;  %v997_v22 = vpop.permute.xlu1 %996 }
 0x166   :  { %v1014_v14 = vsel %vm333_vm2, %v991_v45, %v1003_v29  ;;  %v1020_v18 = vsel %vm333_vm2, %v1003_v29, %v991_v45 }
 0x169   :  { %v1007_v54 = vpop.permute.xlu0 %1006  ;;  %v1001_v48 = vpop.permute.xlu1 %1000 }
 0x16a   :  { %v1016_v5 = vsel %vm333_vm2, %v995_v20, %v1007_v54  ;;  %v1022_v34 = vsel %vm333_vm2, %v1007_v54, %v995_v20 }
 0x16d   :  { %v1011_v41 = vpop.permute.xlu0 %1010  ;;  %v1005_v21 = vpop.permute.xlu1 %1004 }
 0x16e   :  { %v1018_v16 = vsel %vm333_vm2, %v999_v4, %v1011_v41  ;;  %v1024_v61 = vsel %vm333_vm2, %v1011_v41, %v999_v4  ;;  %v1015_v25 = vsel %vm333_vm2, %v993_v2, %v1005_v21  ;;  %v1021_v6 = vsel %vm333_vm2, %v1005_v21, %v993_v2 }
 0x171   :  { %v1031_v17 = vpop.permute.xlu0 %1030  ;;  %v1009_v59 = vpop.permute.xlu1 %1008 }
 0x172   :  { %v1035_v28 = vmul.f32 %v1031_v17, %v1015_v25  ;;  %v1036_v10 = vmul.f32 %v1031_v17, %v1021_v6  ;;  %v1033_v12 = vmul.f32 %v1031_v17, %v1014_v14  ;;  %v1034_v45 = vmul.f32 %v1031_v17, %v1020_v18 }
 0x173   :  { %v1017_v7 = vsel %vm333_vm2, %v997_v22, %v1009_v59  ;;  %v1023_v60 = vsel %vm333_vm2, %v1009_v59, %v997_v22  ;;  %v1037_v55 = vmul.f32 %v1031_v17, %v1016_v5  ;;  %v1038_v20 = vmul.f32 %v1031_v17, %v1022_v34 }
 0x174   :  { %v1039_v58 = vmul.f32 %v1031_v17, %v1017_v7  ;;  %v1040_v40 = vmul.f32 %v1031_v17, %v1023_v60  ;;  %v1047_v35 = vadd.f32 %v1035_v28, %v980_v49  ;;  %v1048_v24 = vadd.f32 %v1036_v10, %v981_v32 }
 0x175   :  { %v2667_v8 = vpop.permute.xlu0 %1196  ;;  %v2669_v53 = vadd.f32 %v1034_v45, %v979_v1  ;;  %v2671_v50 = vadd.f32 %v1033_v12, %v978_v27  ;;  %v1049_v63 = vadd.f32 %v1037_v55, %v982_v31  ;;  %v1050_v46 = vadd.f32 %v1038_v20, %v983_v9  ;;  %v1013_v33 = vpop.permute.xlu1 %1012 }
 0x176   :  { %v1051_v4 = vadd.f32 %v1039_v58, %v984_v52  ;;  %v1052_v2 = vadd.f32 %v1040_v40, %v985_v38  ;;  %v1041_v56 = vmul.f32 %v1031_v17, %v1018_v16  ;;  %v1042_v26 = vmul.f32 %v1031_v17, %v1024_v61 }
 0x177   :  { %v1019_v0 = vsel %vm333_vm2, %v1001_v48, %v1013_v33  ;;  %v1025_v49 = vsel %vm333_vm2, %v1013_v33, %v1001_v48 }
 0x178   :  { %v1043_v32 = vmul.f32 %v1031_v17, %v1019_v0  ;;  %v1044_v29 = vmul.f32 %v1031_v17, %v1025_v49  ;;  %v1053_v14 = vadd.f32 %v1041_v56, %v986_v36  ;;  %v1054_v1 = vadd.f32 %v1042_v26, %v987_v19 }
 0x179   :  { %v2677_v18 = vpop.permute.xlu0 %1200  ;;  %v1170_v9 = vpop.permute.xlu1 %1169 }
 0x17a   :  { %v1055_v27 = vadd.f32 %v1043_v32, %v988_v51  ;;  %v1056_v31 = vadd.f32 %v1044_v29, %v989_v11  ;;  %v1182_v52 = vmul.f32 %v1170_v9, %v2959_v13  ;;  %v1183_v38 = vmul.f32 %v1170_v9, %v2961_v23 }
 0x17b   :  { %v1176_v48 = vmul.f32 %v1170_v9, %v2964_v15  ;;  %v1177_v41 = vmul.f32 %v1170_v9, %v2147_v30  ;;  %v1180_v36 = vmul.f32 %v1170_v9, %v1986_v42  ;;  %v1181_v19 = vmul.f32 %v1170_v9, %v2497_v37 }
 0x17c   :  { %v1194_v5 = vadd.f32 %v1182_v52, %v1055_v27  ;;  %v1195_v34 = vadd.f32 %v1183_v38, %v1056_v31  ;;  %v1174_v6 = vmul.f32 %v1170_v9, %v2001_v47  ;;  %v1175_v17 = vmul.f32 %v1170_v9, %v2960_v3 }
 0x17d   :  { %v2681_v22 = vpop.permute.xlu0 %1204  ;;  %v1199_v54 = vpop.permute.xlu1 %1198  ;;  %v1188_v11 = vadd.f32 %v1176_v48, %v1049_v63  ;;  %v1189_v16 = vadd.f32 %v1177_v41, %v1050_v46  ;;  %v1192_v13 = vadd.f32 %v1180_v36, %v1053_v14  ;;  %v1193_v61 = vadd.f32 %v1181_v19, %v1054_v1 }
 0x17e   :  { %v1178_v59 = vmul.f32 %v1170_v9, %v2958_v62  ;;  %v1179_v28 = vmul.f32 %v1170_v9, %v2135_v43  ;;  %v1186_v10 = vadd.f32 %v1174_v6, %v1047_v35  ;;  %v1187_v12 = vadd.f32 %v1175_v17, %v1048_v24 }
 0x17f   :  { %v1172_v47 = vmul.f32 %v1170_v9, %v2963_v57  ;;  %v1173_v3 = vmul.f32 %v1170_v9, %v2138_v44 }
 0x180   :  { %v1190_v58 = vadd.f32 %v1178_v59, %v1051_v4  ;;  %v1191_v40 = vadd.f32 %v1179_v28, %v1052_v2 }
 0x181   :  { %v2687_v51 = vpop.permute.xlu0 %1303  ;;  %v1203_v23 = vpop.permute.xlu1 %1202  ;;  %v1185_v46 = vadd.f32 %v1173_v3, %v2669_v53  ;;  %v1184_v4 = vadd.f32 %v1172_v47, %v2671_v50 }
 0x185   :  { %v1207_v21 = vpop.permute.xlu0 %1206 }
 0x186   :  { %v1237_v25 = vpop.permute.xlu1 %1236 }
 0x189   :  { %v1211_v15 = vpop.permute.xlu0 %1210 }
 0x18a   :  { %v1221_v30 = vsel %vm197_vm0, %v1199_v54, %v1211_v15  ;;  %v1227_v42 = vsel %vm197_vm0, %v1211_v15, %v1199_v54  ;;  %v2695_v37 = vpop.permute.xlu1 %1370 }
 0x18b   :  { %v1241_v45 = vmul.f32 %v1237_v25, %v1221_v30  ;;  %v1242_v7 = vmul.f32 %v1237_v25, %v1227_v42 }
 0x18d   :  { %v1253_v60 = vadd.f32 %v1241_v45, %v1186_v10  ;;  %v1254_v55 = vadd.f32 %v1242_v7, %v1187_v12  ;;  %v1215_v20 = vpop.permute.xlu0 %1214 }
 0x18e   :  { %v1223_v63 = vsel %vm197_vm0, %v1203_v23, %v1215_v20  ;;  %v1229_v62 = vsel %vm197_vm0, %v1215_v20, %v1203_v23  ;;  %v1209_v43 = vpop.permute.xlu1 %1208 }
 0x18f   :  { %v1245_v35 = vmul.f32 %v1237_v25, %v1223_v63  ;;  %v1246_v24 = vmul.f32 %v1237_v25, %v1229_v62  ;;  %v1220_v57 = vsel %vm197_vm0, %v2667_v8, %v1209_v43  ;;  %v1226_v44 = vsel %vm197_vm0, %v1209_v43, %v2667_v8 }
 0x190   :  { %v1239_v2 = vmul.f32 %v1237_v25, %v1220_v57  ;;  %v1240_v33 = vmul.f32 %v1237_v25, %v1226_v44 }
 0x191   :  { %v1257_v56 = vadd.f32 %v1245_v35, %v1190_v58  ;;  %v1258_v26 = vadd.f32 %v1246_v24, %v1191_v40  ;;  %v1219_v0 = vpop.permute.xlu0 %1218 }
 0x192   :  { %v1251_v49 = vadd.f32 %v1239_v2, %v1184_v4  ;;  %v1252_v32 = vadd.f32 %v1240_v33, %v1185_v46  ;;  %v1225_v29 = vsel %vm197_vm0, %v1207_v21, %v1219_v0  ;;  %v1231_v14 = vsel %vm197_vm0, %v1219_v0, %v1207_v21  ;;  %v1213_v1 = vpop.permute.xlu1 %1212 }
 0x193   :  { %v1249_v27 = vmul.f32 %v1237_v25, %v1225_v29  ;;  %v1250_v8 = vmul.f32 %v1237_v25, %v1231_v14  ;;  %v1222_v53 = vsel %vm197_vm0, %v2677_v18, %v1213_v1  ;;  %v1228_v50 = vsel %vm197_vm0, %v1213_v1, %v2677_v18 }
 0x194   :  { %v1243_v31 = vmul.f32 %v1237_v25, %v1222_v53  ;;  %v1244_v9 = vmul.f32 %v1237_v25, %v1228_v50 }
 0x195   :  { %v1261_v52 = vadd.f32 %v1249_v27, %v1194_v5  ;;  %v1262_v38 = vadd.f32 %v1250_v8, %v1195_v34  ;;  %v1266_v54 = vpop.permute.xlu0 %1265 }
 0x196   :  { %v1255_v48 = vadd.f32 %v1243_v31, %v1188_v11  ;;  %v1256_v41 = vadd.f32 %v1244_v9, %v1189_v16  ;;  %v1217_v36 = vpop.permute.xlu1 %1216 }
 0x197   :  { %v1224_v19 = vsel %vm197_vm0, %v2681_v22, %v1217_v36  ;;  %v1230_v23 = vsel %vm197_vm0, %v1217_v36, %v2681_v22 }
 0x198   :  { %v1247_v21 = vmul.f32 %v1237_v25, %v1224_v19  ;;  %v1248_v6 = vmul.f32 %v1237_v25, %v1230_v23 }
 0x199   :  { %v1270_v17 = vpop.permute.xlu0 %1269 }
 0x19a   :  { %v1259_v18 = vadd.f32 %v1247_v21, %v1192_v13  ;;  %v1260_v15 = vadd.f32 %v1248_v6, %v1193_v61  ;;  %v1264_v30 = vpop.permute.xlu1 %1263 }
 0x19d   :  { %v1274_v5 = vpop.permute.xlu0 %1273 }
 0x19e   :  { %v1268_v34 = vpop.permute.xlu1 %1267 }
 0x1a1   :  { %v1278_v42 = vpop.permute.xlu0 %1277 }
 0x1a2   :  { %v1288_v11 = vsel %vm265_vm1, %v1266_v54, %v1278_v42  ;;  %v1294_v16 = vsel %vm265_vm1, %v1278_v42, %v1266_v54  ;;  %v1272_v59 = vpop.permute.xlu1 %1271 }
 0x1a3   :  { %v1308_v28 = vmul.f32 %v2687_v51, %v1288_v11  ;;  %v1309_v22 = vmul.f32 %v2687_v51, %v1294_v16 }
 0x1a5   :  { %v1320_v10 = vadd.f32 %v1308_v28, %v1253_v60  ;;  %v1321_v25 = vadd.f32 %v1309_v22, %v1254_v55  ;;  %v1282_v12 = vpop.permute.xlu0 %1281 }
 0x1a6   :  { %v1290_v13 = vsel %vm265_vm1, %v1270_v17, %v1282_v12  ;;  %v1296_v61 = vsel %vm265_vm1, %v1282_v12, %v1270_v17  ;;  %v1276_v45 = vpop.permute.xlu1 %1275 }
 0x1a7   :  { %v1312_v7 = vmul.f32 %v2687_v51, %v1290_v13  ;;  %v1313_v47 = vmul.f32 %v2687_v51, %v1296_v61  ;;  %v1287_v3 = vsel %vm265_vm1, %v1264_v30, %v1276_v45  ;;  %v1293_v20 = vsel %vm265_vm1, %v1276_v45, %v1264_v30 }
 0x1a8   :  { %v1306_v60 = vmul.f32 %v2687_v51, %v1287_v3  ;;  %v1307_v55 = vmul.f32 %v2687_v51, %v1293_v20 }
 0x1a9   :  { %v1324_v58 = vadd.f32 %v1312_v7, %v1257_v56  ;;  %v1325_v40 = vadd.f32 %v1313_v47, %v1258_v26  ;;  %v1286_v63 = vpop.permute.xlu0 %1285 }
 0x1aa   :  { %v1318_v62 = vadd.f32 %v1306_v60, %v1251_v49  ;;  %v1319_v43 = vadd.f32 %v1307_v55, %v1252_v32  ;;  %v1292_v35 = vsel %vm265_vm1, %v1274_v5, %v1286_v63  ;;  %v1298_v24 = vsel %vm265_vm1, %v1286_v63, %v1274_v5  ;;  %v1280_v57 = vpop.permute.xlu1 %1279 }
 0x1ab   :  { %v1316_v44 = vmul.f32 %v2687_v51, %v1292_v35  ;;  %v1317_v46 = vmul.f32 %v2687_v51, %v1298_v24  ;;  %v1289_v4 = vsel %vm265_vm1, %v1268_v34, %v1280_v57  ;;  %v1295_v2 = vsel %vm265_vm1, %v1280_v57, %v1268_v34 }
 0x1ac   :  { %v1310_v33 = vmul.f32 %v2687_v51, %v1289_v4  ;;  %v1311_v56 = vmul.f32 %v2687_v51, %v1295_v2 }
 0x1ad   :  { %v1328_v26 = vadd.f32 %v1316_v44, %v1261_v52  ;;  %v1329_v0 = vadd.f32 %v1317_v46, %v1262_v38  ;;  %v1333_v49 = vpop.permute.xlu0 %1332 }
 0x1ae   :  { %v1322_v32 = vadd.f32 %v1310_v33, %v1255_v48  ;;  %v1323_v29 = vadd.f32 %v1311_v56, %v1256_v41  ;;  %v1284_v14 = vpop.permute.xlu1 %1283 }
 0x1af   :  { %v1291_v1 = vsel %vm265_vm1, %v1272_v59, %v1284_v14  ;;  %v1297_v27 = vsel %vm265_vm1, %v1284_v14, %v1272_v59 }
 0x1b0   :  { %v1314_v8 = vmul.f32 %v2687_v51, %v1291_v1  ;;  %v1315_v53 = vmul.f32 %v2687_v51, %v1297_v27 }
 0x1b1   :  { %v1337_v50 = vpop.permute.xlu0 %1336 }
 0x1b2   :  { %v1326_v31 = vadd.f32 %v1314_v8, %v1259_v18  ;;  %v1327_v9 = vadd.f32 %v1315_v53, %v1260_v15  ;;  %v1331_v54 = vpop.permute.xlu1 %1330 }
 0x1b5   :  { %v1341_v52 = vpop.permute.xlu0 %1340 }
 0x1b6   :  { %v1335_v38 = vpop.permute.xlu1 %1334 }
 0x1b9   :  { %v1345_v36 = vpop.permute.xlu0 %1344 }
 0x1ba   :  { %v1355_v48 = vsel %vm333_vm2, %v1333_v49, %v1345_v36  ;;  %v1361_v41 = vsel %vm333_vm2, %v1345_v36, %v1333_v49  ;;  %v1339_v19 = vpop.permute.xlu1 %1338 }
 0x1bb   :  { %v1375_v23 = vmul.f32 %v2695_v37, %v1355_v48  ;;  %v1376_v21 = vmul.f32 %v2695_v37, %v1361_v41 }
 0x1bd   :  { %v1387_v6 = vadd.f32 %v1375_v23, %v1320_v10  ;;  %v1388_v51 = vadd.f32 %v1376_v21, %v1321_v25  ;;  %v1349_v17 = vpop.permute.xlu0 %1348 }
 0x1be   :  { %v1357_v18 = vsel %vm333_vm2, %v1337_v50, %v1349_v17  ;;  %v1363_v15 = vsel %vm333_vm2, %v1349_v17, %v1337_v50  ;;  %v1343_v30 = vpop.permute.xlu1 %1342 }
 0x1bf   :  { %1399 = vst [vmem:[#allocation2 + $0x10] sm:$0xff] %v1387_v6  ;;  %1400 = vst [vmem:[#allocation2 + $0x18] sm:$0xff] %v1388_v51  ;;  %v1379_v5 = vmul.f32 %v2695_v37, %v1357_v18  ;;  %v1380_v34 = vmul.f32 %v2695_v37, %v1363_v15  ;;  %v1354_v42 = vsel %vm333_vm2, %v1331_v54, %v1343_v30 }
 0x1c0   :  { %v1360_v11 = vsel %vm333_vm2, %v1343_v30, %v1331_v54  ;;  %v1373_v16 = vmul.f32 %v2695_v37, %v1354_v42 }
 0x1c1   :  { %v1374_v59 = vmul.f32 %v2695_v37, %v1360_v11  ;;  %v1391_v28 = vadd.f32 %v1379_v5, %v1324_v58  ;;  %v1392_v22 = vadd.f32 %v1380_v34, %v1325_v40  ;;  %v1353_v10 = vpop.permute.xlu0 %1352 }
 0x1c2   :  { %v1385_v25 = vadd.f32 %v1373_v16, %v1318_v62  ;;  %v1359_v13 = vsel %vm333_vm2, %v1341_v52, %v1353_v10  ;;  %v1365_v61 = vsel %vm333_vm2, %v1353_v10, %v1341_v52  ;;  %v1347_v45 = vpop.permute.xlu1 %1346 }
 0x1c3   :  { %v1386_v12 = vadd.f32 %v1374_v59, %v1319_v43  ;;  %1403 = vst [vmem:[#allocation2 + $0x30] sm:$0xff] %v1391_v28  ;;  %1404 = vst [vmem:[#allocation2 + $0x38] sm:$0xff] %v1392_v22  ;;  %v1383_v7 = vmul.f32 %v2695_v37, %v1359_v13  ;;  %v1384_v47 = vmul.f32 %v2695_v37, %v1365_v61 }
 0x1c4   :  { %v1356_v3 = vsel %vm333_vm2, %v1335_v38, %v1347_v45  ;;  %v1362_v20 = vsel %vm333_vm2, %v1347_v45, %v1335_v38  ;;  %1397 = vst [vmem:[#allocation2] sm:$0xff] %v1385_v25 }
 0x1c5   :  { %1398 = vst [vmem:[#allocation2 + $0x8] sm:$0xff] %v1386_v12  ;;  %v1377_v60 = vmul.f32 %v2695_v37, %v1356_v3  ;;  %v1378_v55 = vmul.f32 %v2695_v37, %v1362_v20  ;;  %v1395_v58 = vadd.f32 %v1383_v7, %v1328_v26  ;;  %v1396_v40 = vadd.f32 %v1384_v47, %v1329_v0 }
 0x1c6   :  { %v1351_v43 = vpop.permute.xlu1 %1350 }
 0x1c7   :  { %v1389_v63 = vadd.f32 %v1377_v60, %v1322_v32  ;;  %v1390_v62 = vadd.f32 %v1378_v55, %v1323_v29  ;;  %1407 = vst [vmem:[#allocation2 + $0x50] sm:$0xff] %v1395_v58  ;;  %1408 = vst [vmem:[#allocation2 + $0x58] sm:$0xff] %v1396_v40  ;;  %v1358_v35 = vsel %vm333_vm2, %v1339_v19, %v1351_v43 }
 0x1c8   :  { %v1364_v24 = vsel %vm333_vm2, %v1351_v43, %v1339_v19  ;;  %v1381_v57 = vmul.f32 %v2695_v37, %v1358_v35 }
 0x1c9   :  { %1401 = vst [vmem:[#allocation2 + $0x20] sm:$0xff] %v1389_v63  ;;  %1402 = vst [vmem:[#allocation2 + $0x28] sm:$0xff] %v1390_v62  ;;  %v1382_v44 = vmul.f32 %v2695_v37, %v1364_v24 }
 0x1ca   :  { %v1393_v46 = vadd.f32 %v1381_v57, %v1326_v31 }
 0x1cb   :  { %v1394_v4 = vadd.f32 %v1382_v44, %v1327_v9 }
 0x1cc   :  { %1405 = vst [vmem:[#allocation2 + $0x40] sm:$0xff] %v1393_v46 }
 0x1cd   :  { %1406 = vst [vmem:[#allocation2 + $0x48] sm:$0xff] %v1394_v4 }
 0x1ce   :  { %1460 = shalt.err (!%p1457_p4)
}
 0x1cf   :  { %s1461_s7 = scalar_lea.hbm %s2816_s3, 1536 }
 0x1d0   :  { %p1462_p5 = scmp.ne.s32.totalorder %s2816_s3, %s1461_s7  ;;  %p1465_p6 = scmp.lt.u32.totalorder %s1461_s7, %s2816_s3 }
 0x1d2   :  { %p1467_p7 = pnand %p1465_p6, %p1462_p5 }
 0x1d4   :  { %1470 = shalt.err (!%p1467_p7)
}
 0x1d5   :  { %s1478_s12 = smov 256   ;;  %s1479_s13 = smov 16  }
 0x1d6   :  { %1420 = dma.vmem_to_hbm [thread:$0]  %s1415_s25, 1536, %s2816_s3, [#allocation3], %s1478_s12, %s1478_s12, %s1479_s13  }
 0x1d7   :  { %1471 = dma.done.wait [#allocation3], 1536  }
 0x1d8   :  { %1472 = vsyncadd [#allocation3], 4294965760 }
 0x1d9   :  { %1424 = vsyncpa [#allocation3], 1 }

</bundles_post_ra>
